<compile_context>
chip_gen: v7x
topology: tpu7x:2x2x1
jax: 0.10.0
libtpu: 0.0.40
codegen_flags: <defaults>
</compile_context>

<pallas_src>
import functools
import math

import jax
import jax.numpy as jnp
from jax.experimental import pallas as pl
from jax.experimental.pallas import tpu as pltpu

F_PAD = 128  # lane-dense padded width for every feature / hidden dim


def _gelu(x):
    # exact erf-based GELU (torch.nn.GELU default); VALU polynomial, keeps EUP free
    return 0.5 * x * (1.0 + jax.lax.erf(x * (1.0 / math.sqrt(2.0))))


def _round_up(x, m):
    return (x + m - 1) // m * m


def _cdiv(a, b):
    return -(-a // b)


def _pad2(x, rows, cols):
    r, c = x.shape
    return jnp.pad(x, ((0, rows - r), (0, cols - c)))


def _pick_tile(n, max_tile):
    """Node-tile size: 16-row aligned (bf16 sublane packing), >=2 tiles when possible
    (keeps both v7x TensorCores busy), and never pads n up by more than one tile."""
    n16 = _round_up(max(n, 1), 16)
    n_tiles = max(1, _cdiv(n16, max_tile))
    if n16 >= 32:
        n_tiles = max(n_tiles, 2)
    tile = _round_up(_cdiv(n16, n_tiles), 16)
    return tile, _round_up(n16, tile)


def _uniform(key, shape, scale):
    return jax.random.uniform(key, shape, jnp.float32, -scale, scale)


# --------------------------- Pallas kernels ---------------------------------

def _fused_sage_layer_kernel(neigh_ref, hdst_ref, wcat_ref, b_ref,
                             w_self_ref, w_neigh_ref, bias_ref,
                             ln_g_ref, ln_b_ref, out_ref,
                             *, hidden, gate_widths, k):
    """Grid = (node_tiles,).  All relations handled in a static Python loop with
    VMEM-resident weights; per relation: SAGEConv(lstm) + GELU; relation outputs
    summed (HeteroGraphConv 'sum'); shared LayerNorm fused before a single store."""
    tn = hdst_ref.shape[0]
    gates_w = wcat_ref.shape[-1]
    h_dst = hdst_ref[...]                                   # (tn, F_PAD) bf16
    acc = jnp.zeros((tn, F_PAD), jnp.float32)
    # Hoisted lane index (JAX does not CSE broadcast_in_dim inside loops).
    lane = jax.lax.broadcasted_iota(jnp.int32, (tn, gates_w), 1)

    for r, gw in enumerate(gate_widths):                    # static relation loop
        wcat = wcat_ref[r]                                  # (2*F_PAD, gates_w) bf16 resident
        b = b_ref[r]                                        # (1, gates_w) f32 (b_ih + b_hh)
        packed = (4 * gw <= F_PAD)                          # gates packed into one vreg row
        if packed:
            # gate layout along lanes: [ i | f | g | o | 0-pad ], each gw lanes wide;
            # g uses tanh, i/f/o use sigmoid.
            g_mask = (lane >= 2 * gw) & (lane < 3 * gw)

        # LSTM over the fixed-fan-in neighbor sequence; h0 = c0 = 0; state f32.
        # Padded / rolled-in garbage lanes of h and c are bounded (sigmoid/tanh) and
        # are annihilated by the zero rows of wcat / w_neigh, so real lanes are exact.
        h = jnp.zeros((tn, F_PAD), jnp.float32)
        c = jnp.zeros((tn, F_PAD), jnp.float32)
        for t in range(k):                                  # short static recurrence
            x_t = neigh_ref[r, t]                           # (tn, F_PAD) bf16, lane-dense slab
            # Fused input+hidden projection: [x_t, h] @ [W_ih; W_hh] -> one 256-deep
            # contraction per step (fills a 256x256 MXU pass, no gates_x buffers).
            xh = jnp.concatenate([x_t, h.astype(x_t.dtype)], axis=-1)
            gates = jnp.dot(xh, wcat, preferred_element_type=jnp.float32) + b
            if packed:
                act = jnp.where(g_mask, jnp.tanh(gates), jax.nn.sigmoid(gates))
                # Align each gate's lanes [g*gw:(g+1)*gw] down to [0:gw] via XLU
                # rotation (roll by -g*gw == +gates_w - g*gw); only lanes [0:gw]
                # of c / h are meaningful.
                i_a = act
                f_a = pltpu.roll(act, shift=gates_w - 1 * gw, axis=1)
                g_a = pltpu.roll(act, shift=gates_w - 2 * gw, axis=1)
                o_a = pltpu.roll(act, shift=gates_w - 3 * gw, axis=1)
            else:
                # gw is a multiple of 128 here -> lane-aligned, free slices
                i_a = jax.nn.sigmoid(gates[:, 0 * gw:1 * gw])
                f_a = jax.nn.sigmoid(gates[:, 1 * gw:2 * gw])
                g_a = jnp.tanh(gates[:, 2 * gw:3 * gw])
                o_a = jax.nn.sigmoid(gates[:, 3 * gw:4 * gw])
            c = f_a * c + i_a * g_a
            h = o_a * jnp.tanh(c)

        h_neigh = jnp.dot(h.astype(jnp.bfloat16), w_neigh_ref[r],
                          preferred_element_type=jnp.float32)
        h_self = jnp.dot(h_dst, w_self_ref[r], preferred_element_type=jnp.float32)
        # SAGEConv activation (GELU) per relation, then HeteroGraphConv 'sum'.
        acc = acc + _gelu(h_self + h_neigh + bias_ref[r])

    # Shared LayerNorm.  INVARIANT: padded lanes of acc, ln_g, ln_b are exactly zero,
    # so full-width lane sums equal sums over the real `hidden` columns.
    inv_h = 1.0 / float(hidden)
    mean = jnp.sum(acc, axis=-1, keepdims=True) * inv_h
    msq = jnp.sum(acc * acc, axis=-1, keepdims=True) * inv_h
    var = msq - mean * mean                                 # biased variance (torch)
    y = (acc - mean) * jax.lax.rsqrt(var + 1e-5) * ln_g_ref[...] + ln_b_ref[...]
    out_ref[...] = y.astype(out_ref.dtype)


def _clf_kernel(x_ref, w1_ref, b1_ref, w2_ref, b2_ref, out_ref):
    # BatchNorm(eval) already folded into (w1, b1) on the host.
    x = x_ref[...]                                          # (tn, F_PAD) bf16
    w1 = w1_ref[...]
    h = _gelu(jnp.dot(x, w1, preferred_element_type=jnp.float32) + b1_ref[...])
    # Final (H, 1) projection as VPU multiply + lane reduction (no degenerate matmul).
    # TODO(synk): for very large N, emit a lane-dense logits layout instead of (tn, 1).
    out_ref[...] = jnp.sum(h * w2_ref[...], axis=-1, keepdims=True) + b2_ref[...]


# --------------------------- thin wrappers -----------------------------------

def fused_sage_layer(neigh_all, h_dst, dp, ln_g, ln_b, hidden, max_tile_n=1024):
    """neigh_all: (R, K, N_dst, F_PAD) bf16; h_dst: (N_dst, F_PAD) bf16."""
    r, k, n_dst, f_pad = neigh_all.shape
    tile_n, n_pad = _pick_tile(n_dst, max_tile_n)
    if n_pad != n_dst:
        neigh_all = jnp.pad(neigh_all, ((0, 0), (0, 0), (0, n_pad - n_dst), (0, 0)))
        h_dst = jnp.pad(h_dst, ((0, n_pad - n_dst), (0, 0)))
    gates_w = dp["wcat"].shape[-1]

    kernel = functools.partial(_fused_sage_layer_kernel, hidden=hidden,
                               gate_widths=tuple(dp["gate_widths"]), k=k)

    # VMEM budget: double-buffered streaming blocks + resident weights + headroom
    # for compiler-managed f32 temporaries (re-derived per call, not a blanket 48MiB).
    stream_bytes = r * k * tile_n * f_pad * 2 + 2 * tile_n * f_pad * 2
    resident_bytes = ((dp["wcat"].size + dp["w_self"].size + dp["w_neigh"].size) * 2
                      + (dp["b"].size + dp["bias"].size + 2 * f_pad) * 4)
    vmem_limit = int(min(2 * stream_bytes + resident_bytes + (24 << 20), 100 << 20))

    out = pl.pallas_call(
        kernel,
        out_shape=jax.ShapeDtypeStruct((n_pad, f_pad), jnp.bfloat16),
        grid=(n_pad // tile_n,),
        in_specs=[
            # streaming (node-tiled) inputs
            pl.BlockSpec((r, k, tile_n, f_pad), lambda i: (0, 0, i, 0)),     # neigh
            pl.BlockSpec((tile_n, f_pad), lambda i: (i, 0)),                 # h_dst
            # VMEM-resident weights (constant index_map -> DMA'd once)
            pl.BlockSpec((r, 2 * f_pad, gates_w), lambda i: (0, 0, 0)),      # wcat
            pl.BlockSpec((r, 1, gates_w), lambda i: (0, 0, 0)),              # b
            pl.BlockSpec((r, f_pad, f_pad), lambda i: (0, 0, 0)),            # w_self
            pl.BlockSpec((r, f_pad, f_pad), lambda i: (0, 0, 0)),            # w_neigh
            pl.BlockSpec((r, 1, f_pad), lambda i: (0, 0, 0)),                # bias
            pl.BlockSpec((1, f_pad), lambda i: (0, 0)),                      # ln_g
            pl.BlockSpec((1, f_pad), lambda i: (0, 0)),                      # ln_b
        ],
        out_specs=pl.BlockSpec((tile_n, f_pad), lambda i: (i, 0)),
        compiler_params=pltpu.CompilerParams(
            dimension_semantics=("parallel",),
            vmem_limit_bytes=vmem_limit),
    )(neigh_all, h_dst, dp["wcat"], dp["b"], dp["w_self"], dp["w_neigh"],
      dp["bias"], ln_g, ln_b)
    return out[:n_dst]


def classifier(x, p, max_tile_n=1024):
    n, f_pad = x.shape
    tile_n, n_pad = _pick_tile(n, max_tile_n)
    if n_pad != n:
        x = jnp.pad(x, ((0, n_pad - n), (0, 0)))
    vmem_limit = int(2 * (tile_n * f_pad * 2 + tile_n * 4)
                     + f_pad * f_pad * 2 + (16 << 20))
    out = pl.pallas_call(
        _clf_kernel,
        out_shape=jax.ShapeDtypeStruct((n_pad, 1), jnp.float32),
        grid=(n_pad // tile_n,),
        in_specs=[
            pl.BlockSpec((tile_n, f_pad), lambda i: (i, 0)),
            pl.BlockSpec((f_pad, f_pad), lambda i: (0, 0)),   # w1 (BN folded in)
            pl.BlockSpec((1, f_pad), lambda i: (0, 0)),       # b1
            pl.BlockSpec((1, f_pad), lambda i: (0, 0)),       # w2 (row vector)
            pl.BlockSpec((1, 1), lambda i: (0, 0)),           # b2
        ],
        out_specs=pl.BlockSpec((tile_n, 1), lambda i: (i, 0)),
        compiler_params=pltpu.CompilerParams(
            dimension_semantics=("parallel",),
            vmem_limit_bytes=vmem_limit),
    )(x, p["w1"], p["b1"], p["w2"], p["b2"])
    return out[:n]


# --------------------------- parameter init ----------------------------------

def init_sage_rel_params(key, f_src, f_dst, hidden, gw, gates_w):
    """One relation's SAGEConv(lstm) params.  LSTM weights are packed as a fused
    [W_ih; W_hh] (2*F_PAD, gates_w) matrix; per-gate width gw (packed lanes when
    4*f_src <= 128, else 128-wide lane-aligned blocks).  Padded rows/cols are zero."""
    assert max(f_src, f_dst, hidden) <= F_PAD
    ks = jax.random.split(key, 4)
    s_l = 1.0 / math.sqrt(f_src)          # torch LSTM init scale (LSTM hidden = f_src)

    wcat = jnp.zeros((2 * F_PAD, gates_w), jnp.float32)
    b = jnp.zeros((1, gates_w), jnp.float32)
    for g in range(4):                    # gate order (i, f, g, o), PyTorch layout
        kg = jax.random.fold_in(ks[0], g)
        k_ih, k_hh, kb_ih, kb_hh = jax.random.split(kg, 4)
        wcat = wcat.at[0:f_src, g * gw:g * gw + f_src].set(
            _uniform(k_ih, (f_src, f_src), s_l))                        # W_ih^T block
        wcat = wcat.at[F_PAD:F_PAD + f_src, g * gw:g * gw + f_src].set(
            _uniform(k_hh, (f_src, f_src), s_l))                        # W_hh^T block
        b = b.at[0, g * gw:g * gw + f_src].set(
            _uniform(kb_ih, (f_src,), s_l) + _uniform(kb_hh, (f_src,), s_l))

    return {
        "wcat": wcat,
        "b": b,
        "w_self": _pad2(_uniform(ks[1], (f_dst, hidden), 1.0 / math.sqrt(f_dst)),
                        F_PAD, F_PAD),
        "w_neigh": _pad2(_uniform(ks[2], (f_src, hidden), 1.0 / math.sqrt(f_src)),
                         F_PAD, F_PAD),
        "bias": jnp.zeros((1, F_PAD), jnp.float32),
    }


def init_clf_params(key, hidden):
    ks = jax.random.split(key, 4)
    s1 = 1.0 / math.sqrt(hidden)
    w1 = _uniform(ks[0], (hidden, hidden), s1)
    b1 = _uniform(ks[1], (1, hidden), s1)
    # BatchNorm1d eval-mode (fresh module: gamma=1, beta=0, running m=0, v=1),
    # folded into the first Linear:  y = x*a + c ;  y@w1 + b1 = x@(a*w1) + (c@w1 + b1)
    bn_g = jnp.ones((hidden,), jnp.float32)
    bn_b = jnp.zeros((hidden,), jnp.float32)
    bn_m = jnp.zeros((hidden,), jnp.float32)
    bn_v = jnp.ones((hidden,), jnp.float32)
    a = bn_g * jax.lax.rsqrt(bn_v + 1e-5)
    c = bn_b - bn_m * a
    w1_f = w1 * a[:, None]
    b1_f = b1 + c[None, :] @ w1
    return {
        "w1": _pad2(w1_f, F_PAD, F_PAD).astype(jnp.bfloat16),
        "b1": _pad2(b1_f, 1, F_PAD),
        "w2": _pad2(_uniform(ks[2], (hidden, 1), s1).T, 1, F_PAD),   # row vector
        "b2": _uniform(ks[3], (1, 1), s1),
    }


def init_hetero_params(key, feat_dict, hidden):
    keys = iter(jax.random.split(key, 4 * len(feat_dict) + 8))
    layers = []
    for layer_idx in range(2):
        by_dst = {}
        for rel, feats in feat_dict.items():
            src_t, _, dst_t = rel
            f_src, f_dst = (feats[0], feats[1]) if layer_idx == 0 else (hidden, hidden)
            by_dst.setdefault(dst_t, []).append((rel, src_t, f_src, f_dst))
        layer = {}
        for dst_t, entries in by_dst.items():
            packed = all(4 * fs <= F_PAD for _, _, fs, _ in entries)
            gws = tuple((fs if packed else F_PAD) for _, _, fs, _ in entries)
            gates_w = F_PAD if packed else 4 * F_PAD
            plist = [init_sage_rel_params(next(keys), fs, fd, hidden, gw, gates_w)
                     for (_, _, fs, fd), gw in zip(entries, gws)]
            layer[dst_t] = {
                "wcat": jnp.stack([p["wcat"] for p in plist]).astype(jnp.bfloat16),
                "b": jnp.stack([p["b"] for p in plist]).astype(jnp.float32),
                "w_self": jnp.stack([p["w_self"] for p in plist]).astype(jnp.bfloat16),
                "w_neigh": jnp.stack([p["w_neigh"] for p in plist]).astype(jnp.bfloat16),
                "bias": jnp.stack([p["bias"] for p in plist]).astype(jnp.float32),
                "rels": [e[0] for e in entries],
                "src_types": [e[1] for e in entries],
                "gate_widths": gws,
            }
        layers.append(layer)
    return {
        "layers": layers,
        "ln_g": _pad2(jnp.ones((1, hidden), jnp.float32), 1, F_PAD),
        "ln_b": jnp.zeros((1, F_PAD), jnp.float32),
        "clf": init_clf_params(next(keys), hidden),
    }


# --------------------------- forward pass -------------------------------------

def hetero_graphsage_forward(h_dict, blocks, params, hidden, task="claim"):
    # pad feature dims to 128 lanes, bf16 (MXU-friendly, half the DMA bytes)
    h = {nt: _pad2(v, v.shape[0], F_PAD).astype(jnp.bfloat16)
         for nt, v in h_dict.items()}
    for layer_params, block in zip(params["layers"], blocks):
        new_h = {}
        for dst_t, dp in layer_params.items():
            # Neighbor sequences gathered directly into the (R, K, N, F_PAD) layout the
            # kernel streams (per-t access is a dense (tile_n, 128) slab).
            # TODO(synk): replace this host-side gather with an in-kernel DMA gather
            # (scalar-prefetched neighbor indices + manual make_async_copy) to avoid
            # materializing the (R, K, N, 128) tensor in HBM at scale.
            neigh_all = jnp.stack(
                [jnp.take(h[src_t], block[rel].T, axis=0)      # (K, N_dst, F_PAD)
                 for rel, src_t in zip(dp["rels"], dp["src_types"])], axis=0)
            new_h[dst_t] = fused_sage_layer(
                neigh_all, h[dst_t], dp, params["ln_g"], params["ln_b"], hidden)
        h = new_h
    return classifier(h[task], params["clf"])


# --------------------------- demo / test ---------------------------------------

if __name__ == "__main__":
    N_CLAIM, N_USER, K, HIDDEN = 16, 16, 4, 32
    F_USER, F_CLAIM = 16, 24

    feat_dict = {
        ("user", "posts", "claim"): (F_USER, F_CLAIM, K),
        ("claim", "related_to", "claim"): (F_CLAIM, F_CLAIM, K),
        ("claim", "posted_by", "user"): (F_CLAIM, F_USER, K),
    }
    n_nodes = {"user": N_USER, "claim": N_CLAIM}
    feat_dims = {"user": F_USER, "claim": F_CLAIM}

    keys = iter(jax.random.split(jax.random.PRNGKey(0), 64))

    h_dict = {
        nt: jax.random.normal(next(keys), (n_nodes[nt], feat_dims[nt]), jnp.float32)
        for nt in ("user", "claim")
    }

    # two MFG "blocks": per-relation fixed fan-in neighbor index tables
    blocks = []
    for _ in range(2):
        blk = {}
        for rel in feat_dict:
            src_t, _, dst_t = rel
            blk[rel] = jax.random.randint(
                next(keys), (n_nodes[dst_t], K), 0, n_nodes[src_t], dtype=jnp.int32)
        blocks.append(blk)

    params = init_hetero_params(next(keys), feat_dict, HIDDEN)

    out = hetero_graphsage_forward(h_dict, blocks, params, HIDDEN, task="claim")
    out = jax.block_until_ready(out)
    assert out.shape == (N_CLAIM, 1) and out.dtype == jnp.float32
    assert bool(jnp.all(jnp.isfinite(out)))
    print("KERNEL_OK")
</pallas_src>

<mosaic_0001>
module attributes {stable_mosaic.version = 11 : i64} {
  func.func @_fused_sage_layer_kernel(%arg0: i32, %arg1: memref<2x4x16x128xbf16, #tpu.memory_space<vmem>>, %arg2: memref<16x128xbf16, #tpu.memory_space<vmem>>, %arg3: memref<2x256x128xbf16, #tpu.memory_space<vmem>>, %arg4: memref<2x1x128xf32, #tpu.memory_space<vmem>>, %arg5: memref<2x128x128xbf16, #tpu.memory_space<vmem>>, %arg6: memref<2x128x128xbf16, #tpu.memory_space<vmem>>, %arg7: memref<2x1x128xf32, #tpu.memory_space<vmem>>, %arg8: memref<1x128xf32, #tpu.memory_space<vmem>>, %arg9: memref<1x128xf32, #tpu.memory_space<vmem>>, %arg10: memref<16x128xbf16, #tpu.memory_space<vmem>>) attributes {dimension_semantics = [#tpu.dimension_semantics<parallel>], iteration_bounds = array<i64: 1>, scalar_prefetch = 0 : i64, scratch_operands = 0 : i64, tpu.core_type = #tpu.core_type<tc>, window_params = [{transform_indices = @transform_0, window_bounds = array<i64: 2, 4, 16, 128>}, {transform_indices = @transform_1, window_bounds = array<i64: 16, 128>}, {pipeline_mode = #tpu.pipeline_mode<synchronous>, transform_indices = @transform_2, window_bounds = array<i64: 2, 256, 128>}, {pipeline_mode = #tpu.pipeline_mode<synchronous>, transform_indices = @transform_3, window_bounds = array<i64: 2, 1, 128>}, {pipeline_mode = #tpu.pipeline_mode<synchronous>, transform_indices = @transform_4, window_bounds = array<i64: 2, 128, 128>}, {pipeline_mode = #tpu.pipeline_mode<synchronous>, transform_indices = @transform_5, window_bounds = array<i64: 2, 128, 128>}, {pipeline_mode = #tpu.pipeline_mode<synchronous>, transform_indices = @transform_6, window_bounds = array<i64: 2, 1, 128>}, {pipeline_mode = #tpu.pipeline_mode<synchronous>, transform_indices = @transform_7, window_bounds = array<i64: 1, 128>}, {pipeline_mode = #tpu.pipeline_mode<synchronous>, transform_indices = @transform_8, window_bounds = array<i64: 1, 128>}, {transform_indices = @transform_9, window_bounds = array<i64: 16, 128>}]} {
    %c0 = arith.constant 0 : index
    %c0_0 = arith.constant 0 : index
    %0 = vector.load %arg2[%c0, %c0_0] : memref<16x128xbf16, #tpu.memory_space<vmem>>, vector<16x128xbf16>
    %cst = arith.constant 0.000000e+00 : f32
    %1 = vector.broadcast %cst : f32 to vector<16x128xf32>
    %2 = tpu.iota {dimensions = array<i32: 1>} : vector<16x128xi32>
    %c0_1 = arith.constant 0 : index
    %c0_2 = arith.constant 0 : index
    %c0_3 = arith.constant 0 : index
    %3 = vector.load %arg3[%c0_1, %c0_2, %c0_3] : memref<2x256x128xbf16, #tpu.memory_space<vmem>>, vector<1x256x128xbf16>
    %4 = vector.shape_cast %3 : vector<1x256x128xbf16> to vector<256x128xbf16>
    %c0_4 = arith.constant 0 : index
    %c0_5 = arith.constant 0 : index
    %c0_6 = arith.constant 0 : index
    %5 = vector.load %arg4[%c0_4, %c0_5, %c0_6] : memref<2x1x128xf32, #tpu.memory_space<vmem>>, vector<1x1x128xf32>
    %6 = vector.shape_cast %5 : vector<1x1x128xf32> to vector<1x128xf32>
    %c32_i32 = arith.constant 32 : i32
    %7 = vector.broadcast %c32_i32 : i32 to vector<16x128xi32>
    %8 = arith.cmpi sge, %2, %7 : vector<16x128xi32>
    %c48_i32 = arith.constant 48 : i32
    %9 = vector.broadcast %c48_i32 : i32 to vector<16x128xi32>
    %10 = arith.cmpi slt, %2, %9 : vector<16x128xi32>
    %11 = arith.andi %8, %10 : vector<16x128xi1>
    %cst_7 = arith.constant 0.000000e+00 : f32
    %12 = vector.broadcast %cst_7 : f32 to vector<16x128xf32>
    %cst_8 = arith.constant 0.000000e+00 : f32
    %13 = vector.broadcast %cst_8 : f32 to vector<16x128xf32>
    %c0_9 = arith.constant 0 : index
    %c0_10 = arith.constant 0 : index
    %c0_11 = arith.constant 0 : index
    %c0_12 = arith.constant 0 : index
    %14 = vector.load %arg1[%c0_9, %c0_10, %c0_11, %c0_12] : memref<2x4x16x128xbf16, #tpu.memory_space<vmem>>, vector<1x1x16x128xbf16>
    %15 = vector.shape_cast %14 : vector<1x1x16x128xbf16> to vector<16x128xbf16>
    %16 = arith.truncf %12 : vector<16x128xf32> to vector<16x128xbf16>
    %17 = tpu.concatenate %15, %16 in 1 : vector<16x128xbf16>, vector<16x128xbf16> -> vector<16x256xbf16>
    %cst_13 = arith.constant dense<0.000000e+00> : vector<16x128xf32>
    %18 = tpu.matmul %17, %4, %cst_13 {dimension_numbers = #tpu.dot_dimension_numbers<[1], [0], [0], [1], [0, 0, 1, 1], [], []>} : vector<16x256xbf16>, vector<256x128xbf16>, vector<16x128xf32> -> vector<16x128xf32>
    %19 = vector.broadcast %6 : vector<1x128xf32> to vector<16x128xf32>
    %20 = arith.addf %18, %19 : vector<16x128xf32>
    %21 = math.tanh %20 : vector<16x128xf32>
    %22 = arith.negf %20 : vector<16x128xf32>
    %23 = math.exp %22 : vector<16x128xf32>
    %cst_14 = arith.constant 1.000000e+00 : f32
    %24 = vector.broadcast %cst_14 : f32 to vector<16x128xf32>
    %25 = arith.addf %24, %23 : vector<16x128xf32>
    %26 = arith.divf %24, %25 : vector<16x128xf32>
    %27 = arith.select %11, %21, %26 : vector<16x128xi1>, vector<16x128xf32>
    %c112_i32 = arith.constant 112 : i32
    %28 = tpu.dynamic_rotate %27 by %c112_i32 dim 1 : vector<16x128xf32>, i32 -> vector<16x128xf32>
    %c96_i32 = arith.constant 96 : i32
    %29 = tpu.dynamic_rotate %27 by %c96_i32 dim 1 : vector<16x128xf32>, i32 -> vector<16x128xf32>
    %c80_i32 = arith.constant 80 : i32
    %30 = tpu.dynamic_rotate %27 by %c80_i32 dim 1 : vector<16x128xf32>, i32 -> vector<16x128xf32>
    %31 = arith.mulf %28, %13 : vector<16x128xf32>
    %32 = arith.mulf %27, %29 : vector<16x128xf32>
    %33 = arith.addf %31, %32 : vector<16x128xf32>
    %34 = math.tanh %33 : vector<16x128xf32>
    %35 = arith.mulf %30, %34 : vector<16x128xf32>
    %c0_15 = arith.constant 0 : index
    %c1 = arith.constant 1 : index
    %c0_16 = arith.constant 0 : index
    %c0_17 = arith.constant 0 : index
    %36 = vector.load %arg1[%c0_15, %c1, %c0_16, %c0_17] : memref<2x4x16x128xbf16, #tpu.memory_space<vmem>>, vector<1x1x16x128xbf16>
    %37 = vector.shape_cast %36 : vector<1x1x16x128xbf16> to vector<16x128xbf16>
    %38 = arith.truncf %35 : vector<16x128xf32> to vector<16x128xbf16>
    %39 = tpu.concatenate %37, %38 in 1 : vector<16x128xbf16>, vector<16x128xbf16> -> vector<16x256xbf16>
    %cst_18 = arith.constant dense<0.000000e+00> : vector<16x128xf32>
    %40 = tpu.matmul %39, %4, %cst_18 {dimension_numbers = #tpu.dot_dimension_numbers<[1], [0], [0], [1], [0, 0, 1, 1], [], []>} : vector<16x256xbf16>, vector<256x128xbf16>, vector<16x128xf32> -> vector<16x128xf32>
    %41 = vector.broadcast %6 : vector<1x128xf32> to vector<16x128xf32>
    %42 = arith.addf %40, %41 : vector<16x128xf32>
    %43 = math.tanh %42 : vector<16x128xf32>
    %44 = arith.negf %42 : vector<16x128xf32>
    %45 = math.exp %44 : vector<16x128xf32>
    %cst_19 = arith.constant 1.000000e+00 : f32
    %46 = vector.broadcast %cst_19 : f32 to vector<16x128xf32>
    %47 = arith.addf %46, %45 : vector<16x128xf32>
    %48 = arith.divf %46, %47 : vector<16x128xf32>
    %49 = arith.select %11, %43, %48 : vector<16x128xi1>, vector<16x128xf32>
    %c112_i32_20 = arith.constant 112 : i32
    %50 = tpu.dynamic_rotate %49 by %c112_i32_20 dim 1 : vector<16x128xf32>, i32 -> vector<16x128xf32>
    %c96_i32_21 = arith.constant 96 : i32
    %51 = tpu.dynamic_rotate %49 by %c96_i32_21 dim 1 : vector<16x128xf32>, i32 -> vector<16x128xf32>
    %c80_i32_22 = arith.constant 80 : i32
    %52 = tpu.dynamic_rotate %49 by %c80_i32_22 dim 1 : vector<16x128xf32>, i32 -> vector<16x128xf32>
    %53 = arith.mulf %50, %33 : vector<16x128xf32>
    %54 = arith.mulf %49, %51 : vector<16x128xf32>
    %55 = arith.addf %53, %54 : vector<16x128xf32>
    %56 = math.tanh %55 : vector<16x128xf32>
    %57 = arith.mulf %52, %56 : vector<16x128xf32>
    %c0_23 = arith.constant 0 : index
    %c2 = arith.constant 2 : index
    %c0_24 = arith.constant 0 : index
    %c0_25 = arith.constant 0 : index
    %58 = vector.load %arg1[%c0_23, %c2, %c0_24, %c0_25] : memref<2x4x16x128xbf16, #tpu.memory_space<vmem>>, vector<1x1x16x128xbf16>
    %59 = vector.shape_cast %58 : vector<1x1x16x128xbf16> to vector<16x128xbf16>
    %60 = arith.truncf %57 : vector<16x128xf32> to vector<16x128xbf16>
    %61 = tpu.concatenate %59, %60 in 1 : vector<16x128xbf16>, vector<16x128xbf16> -> vector<16x256xbf16>
    %cst_26 = arith.constant dense<0.000000e+00> : vector<16x128xf32>
    %62 = tpu.matmul %61, %4, %cst_26 {dimension_numbers = #tpu.dot_dimension_numbers<[1], [0], [0], [1], [0, 0, 1, 1], [], []>} : vector<16x256xbf16>, vector<256x128xbf16>, vector<16x128xf32> -> vector<16x128xf32>
    %63 = vector.broadcast %6 : vector<1x128xf32> to vector<16x128xf32>
    %64 = arith.addf %62, %63 : vector<16x128xf32>
    %65 = math.tanh %64 : vector<16x128xf32>
    %66 = arith.negf %64 : vector<16x128xf32>
    %67 = math.exp %66 : vector<16x128xf32>
    %cst_27 = arith.constant 1.000000e+00 : f32
    %68 = vector.broadcast %cst_27 : f32 to vector<16x128xf32>
    %69 = arith.addf %68, %67 : vector<16x128xf32>
    %70 = arith.divf %68, %69 : vector<16x128xf32>
    %71 = arith.select %11, %65, %70 : vector<16x128xi1>, vector<16x128xf32>
    %c112_i32_28 = arith.constant 112 : i32
    %72 = tpu.dynamic_rotate %71 by %c112_i32_28 dim 1 : vector<16x128xf32>, i32 -> vector<16x128xf32>
    %c96_i32_29 = arith.constant 96 : i32
    %73 = tpu.dynamic_rotate %71 by %c96_i32_29 dim 1 : vector<16x128xf32>, i32 -> vector<16x128xf32>
    %c80_i32_30 = arith.constant 80 : i32
    %74 = tpu.dynamic_rotate %71 by %c80_i32_30 dim 1 : vector<16x128xf32>, i32 -> vector<16x128xf32>
    %75 = arith.mulf %72, %55 : vector<16x128xf32>
    %76 = arith.mulf %71, %73 : vector<16x128xf32>
    %77 = arith.addf %75, %76 : vector<16x128xf32>
    %78 = math.tanh %77 : vector<16x128xf32>
    %79 = arith.mulf %74, %78 : vector<16x128xf32>
    %c0_31 = arith.constant 0 : index
    %c3 = arith.constant 3 : index
    %c0_32 = arith.constant 0 : index
    %c0_33 = arith.constant 0 : index
    %80 = vector.load %arg1[%c0_31, %c3, %c0_32, %c0_33] : memref<2x4x16x128xbf16, #tpu.memory_space<vmem>>, vector<1x1x16x128xbf16>
    %81 = vector.shape_cast %80 : vector<1x1x16x128xbf16> to vector<16x128xbf16>
    %82 = arith.truncf %79 : vector<16x128xf32> to vector<16x128xbf16>
    %83 = tpu.concatenate %81, %82 in 1 : vector<16x128xbf16>, vector<16x128xbf16> -> vector<16x256xbf16>
    %cst_34 = arith.constant dense<0.000000e+00> : vector<16x128xf32>
    %84 = tpu.matmul %83, %4, %cst_34 {dimension_numbers = #tpu.dot_dimension_numbers<[1], [0], [0], [1], [0, 0, 1, 1], [], []>} : vector<16x256xbf16>, vector<256x128xbf16>, vector<16x128xf32> -> vector<16x128xf32>
    %85 = vector.broadcast %6 : vector<1x128xf32> to vector<16x128xf32>
    %86 = arith.addf %84, %85 : vector<16x128xf32>
    %87 = math.tanh %86 : vector<16x128xf32>
    %88 = arith.negf %86 : vector<16x128xf32>
    %89 = math.exp %88 : vector<16x128xf32>
    %cst_35 = arith.constant 1.000000e+00 : f32
    %90 = vector.broadcast %cst_35 : f32 to vector<16x128xf32>
    %91 = arith.addf %90, %89 : vector<16x128xf32>
    %92 = arith.divf %90, %91 : vector<16x128xf32>
    %93 = arith.select %11, %87, %92 : vector<16x128xi1>, vector<16x128xf32>
    %c112_i32_36 = arith.constant 112 : i32
    %94 = tpu.dynamic_rotate %93 by %c112_i32_36 dim 1 : vector<16x128xf32>, i32 -> vector<16x128xf32>
    %c96_i32_37 = arith.constant 96 : i32
    %95 = tpu.dynamic_rotate %93 by %c96_i32_37 dim 1 : vector<16x128xf32>, i32 -> vector<16x128xf32>
    %c80_i32_38 = arith.constant 80 : i32
    %96 = tpu.dynamic_rotate %93 by %c80_i32_38 dim 1 : vector<16x128xf32>, i32 -> vector<16x128xf32>
    %97 = arith.mulf %94, %77 : vector<16x128xf32>
    %98 = arith.mulf %93, %95 : vector<16x128xf32>
    %99 = arith.addf %97, %98 : vector<16x128xf32>
    %100 = math.tanh %99 : vector<16x128xf32>
    %101 = arith.mulf %96, %100 : vector<16x128xf32>
    %102 = arith.truncf %101 : vector<16x128xf32> to vector<16x128xbf16>
    %c0_39 = arith.constant 0 : index
    %c0_40 = arith.constant 0 : index
    %c0_41 = arith.constant 0 : index
    %103 = vector.load %arg6[%c0_39, %c0_40, %c0_41] : memref<2x128x128xbf16, #tpu.memory_space<vmem>>, vector<1x128x128xbf16>
    %104 = vector.shape_cast %103 : vector<1x128x128xbf16> to vector<128x128xbf16>
    %cst_42 = arith.constant dense<0.000000e+00> : vector<16x128xf32>
    %105 = tpu.matmul %102, %104, %cst_42 {dimension_numbers = #tpu.dot_dimension_numbers<[1], [0], [0], [1], [0, 0, 1, 1], [], []>} : vector<16x128xbf16>, vector<128x128xbf16>, vector<16x128xf32> -> vector<16x128xf32>
    %c0_43 = arith.constant 0 : index
    %c0_44 = arith.constant 0 : index
    %c0_45 = arith.constant 0 : index
    %106 = vector.load %arg5[%c0_43, %c0_44, %c0_45] : memref<2x128x128xbf16, #tpu.memory_space<vmem>>, vector<1x128x128xbf16>
    %107 = vector.shape_cast %106 : vector<1x128x128xbf16> to vector<128x128xbf16>
    %cst_46 = arith.constant dense<0.000000e+00> : vector<16x128xf32>
    %108 = tpu.matmul %0, %107, %cst_46 {dimension_numbers = #tpu.dot_dimension_numbers<[1], [0], [0], [1], [0, 0, 1, 1], [], []>} : vector<16x128xbf16>, vector<128x128xbf16>, vector<16x128xf32> -> vector<16x128xf32>
    %109 = arith.addf %108, %105 : vector<16x128xf32>
    %c0_47 = arith.constant 0 : index
    %c0_48 = arith.constant 0 : index
    %c0_49 = arith.constant 0 : index
    %110 = vector.load %arg7[%c0_47, %c0_48, %c0_49] : memref<2x1x128xf32, #tpu.memory_space<vmem>>, vector<1x1x128xf32>
    %111 = vector.shape_cast %110 : vector<1x1x128xf32> to vector<1x128xf32>
    %112 = vector.broadcast %111 : vector<1x128xf32> to vector<16x128xf32>
    %113 = arith.addf %109, %112 : vector<16x128xf32>
    %cst_50 = arith.constant 5.000000e-01 : f32
    %114 = vector.broadcast %cst_50 : f32 to vector<16x128xf32>
    %115 = arith.mulf %114, %113 : vector<16x128xf32>
    %cst_51 = arith.constant 0.707106769 : f32
    %116 = vector.broadcast %cst_51 : f32 to vector<16x128xf32>
    %117 = arith.mulf %113, %116 : vector<16x128xf32>
    %118 = math.erf %117 : vector<16x128xf32>
    %cst_52 = arith.constant 1.000000e+00 : f32
    %119 = vector.broadcast %cst_52 : f32 to vector<16x128xf32>
    %120 = arith.addf %119, %118 : vector<16x128xf32>
    %121 = arith.mulf %115, %120 : vector<16x128xf32>
    %122 = arith.addf %1, %121 : vector<16x128xf32>
    %c1_53 = arith.constant 1 : index
    %c0_54 = arith.constant 0 : index
    %c0_55 = arith.constant 0 : index
    %123 = vector.load %arg3[%c1_53, %c0_54, %c0_55] : memref<2x256x128xbf16, #tpu.memory_space<vmem>>, vector<1x256x128xbf16>
    %124 = vector.shape_cast %123 : vector<1x256x128xbf16> to vector<256x128xbf16>
    %c1_56 = arith.constant 1 : index
    %c0_57 = arith.constant 0 : index
    %c0_58 = arith.constant 0 : index
    %125 = vector.load %arg4[%c1_56, %c0_57, %c0_58] : memref<2x1x128xf32, #tpu.memory_space<vmem>>, vector<1x1x128xf32>
    %126 = vector.shape_cast %125 : vector<1x1x128xf32> to vector<1x128xf32>
    %c48_i32_59 = arith.constant 48 : i32
    %127 = vector.broadcast %c48_i32_59 : i32 to vector<16x128xi32>
    %128 = arith.cmpi sge, %2, %127 : vector<16x128xi32>
    %c72_i32 = arith.constant 72 : i32
    %129 = vector.broadcast %c72_i32 : i32 to vector<16x128xi32>
    %130 = arith.cmpi slt, %2, %129 : vector<16x128xi32>
    %131 = arith.andi %128, %130 : vector<16x128xi1>
    %cst_60 = arith.constant 0.000000e+00 : f32
    %132 = vector.broadcast %cst_60 : f32 to vector<16x128xf32>
    %cst_61 = arith.constant 0.000000e+00 : f32
    %133 = vector.broadcast %cst_61 : f32 to vector<16x128xf32>
    %c1_62 = arith.constant 1 : index
    %c0_63 = arith.constant 0 : index
    %c0_64 = arith.constant 0 : index
    %c0_65 = arith.constant 0 : index
    %134 = vector.load %arg1[%c1_62, %c0_63, %c0_64, %c0_65] : memref<2x4x16x128xbf16, #tpu.memory_space<vmem>>, vector<1x1x16x128xbf16>
    %135 = vector.shape_cast %134 : vector<1x1x16x128xbf16> to vector<16x128xbf16>
    %136 = arith.truncf %132 : vector<16x128xf32> to vector<16x128xbf16>
    %137 = tpu.concatenate %135, %136 in 1 : vector<16x128xbf16>, vector<16x128xbf16> -> vector<16x256xbf16>
    %cst_66 = arith.constant dense<0.000000e+00> : vector<16x128xf32>
    %138 = tpu.matmul %137, %124, %cst_66 {dimension_numbers = #tpu.dot_dimension_numbers<[1], [0], [0], [1], [0, 0, 1, 1], [], []>} : vector<16x256xbf16>, vector<256x128xbf16>, vector<16x128xf32> -> vector<16x128xf32>
    %139 = vector.broadcast %126 : vector<1x128xf32> to vector<16x128xf32>
    %140 = arith.addf %138, %139 : vector<16x128xf32>
    %141 = math.tanh %140 : vector<16x128xf32>
    %142 = arith.negf %140 : vector<16x128xf32>
    %143 = math.exp %142 : vector<16x128xf32>
    %cst_67 = arith.constant 1.000000e+00 : f32
    %144 = vector.broadcast %cst_67 : f32 to vector<16x128xf32>
    %145 = arith.addf %144, %143 : vector<16x128xf32>
    %146 = arith.divf %144, %145 : vector<16x128xf32>
    %147 = arith.select %131, %141, %146 : vector<16x128xi1>, vector<16x128xf32>
    %c104_i32 = arith.constant 104 : i32
    %148 = tpu.dynamic_rotate %147 by %c104_i32 dim 1 : vector<16x128xf32>, i32 -> vector<16x128xf32>
    %c80_i32_68 = arith.constant 80 : i32
    %149 = tpu.dynamic_rotate %147 by %c80_i32_68 dim 1 : vector<16x128xf32>, i32 -> vector<16x128xf32>
    %c56_i32 = arith.constant 56 : i32
    %150 = tpu.dynamic_rotate %147 by %c56_i32 dim 1 : vector<16x128xf32>, i32 -> vector<16x128xf32>
    %151 = arith.mulf %148, %133 : vector<16x128xf32>
    %152 = arith.mulf %147, %149 : vector<16x128xf32>
    %153 = arith.addf %151, %152 : vector<16x128xf32>
    %154 = math.tanh %153 : vector<16x128xf32>
    %155 = arith.mulf %150, %154 : vector<16x128xf32>
    %c1_69 = arith.constant 1 : index
    %c1_70 = arith.constant 1 : index
    %c0_71 = arith.constant 0 : index
    %c0_72 = arith.constant 0 : index
    %156 = vector.load %arg1[%c1_69, %c1_70, %c0_71, %c0_72] : memref<2x4x16x128xbf16, #tpu.memory_space<vmem>>, vector<1x1x16x128xbf16>
    %157 = vector.shape_cast %156 : vector<1x1x16x128xbf16> to vector<16x128xbf16>
    %158 = arith.truncf %155 : vector<16x128xf32> to vector<16x128xbf16>
    %159 = tpu.concatenate %157, %158 in 1 : vector<16x128xbf16>, vector<16x128xbf16> -> vector<16x256xbf16>
    %cst_73 = arith.constant dense<0.000000e+00> : vector<16x128xf32>
    %160 = tpu.matmul %159, %124, %cst_73 {dimension_numbers = #tpu.dot_dimension_numbers<[1], [0], [0], [1], [0, 0, 1, 1], [], []>} : vector<16x256xbf16>, vector<256x128xbf16>, vector<16x128xf32> -> vector<16x128xf32>
    %161 = vector.broadcast %126 : vector<1x128xf32> to vector<16x128xf32>
    %162 = arith.addf %160, %161 : vector<16x128xf32>
    %163 = math.tanh %162 : vector<16x128xf32>
    %164 = arith.negf %162 : vector<16x128xf32>
    %165 = math.exp %164 : vector<16x128xf32>
    %cst_74 = arith.constant 1.000000e+00 : f32
    %166 = vector.broadcast %cst_74 : f32 to vector<16x128xf32>
    %167 = arith.addf %166, %165 : vector<16x128xf32>
    %168 = arith.divf %166, %167 : vector<16x128xf32>
    %169 = arith.select %131, %163, %168 : vector<16x128xi1>, vector<16x128xf32>
    %c104_i32_75 = arith.constant 104 : i32
    %170 = tpu.dynamic_rotate %169 by %c104_i32_75 dim 1 : vector<16x128xf32>, i32 -> vector<16x128xf32>
    %c80_i32_76 = arith.constant 80 : i32
    %171 = tpu.dynamic_rotate %169 by %c80_i32_76 dim 1 : vector<16x128xf32>, i32 -> vector<16x128xf32>
    %c56_i32_77 = arith.constant 56 : i32
    %172 = tpu.dynamic_rotate %169 by %c56_i32_77 dim 1 : vector<16x128xf32>, i32 -> vector<16x128xf32>
    %173 = arith.mulf %170, %153 : vector<16x128xf32>
    %174 = arith.mulf %169, %171 : vector<16x128xf32>
    %175 = arith.addf %173, %174 : vector<16x128xf32>
    %176 = math.tanh %175 : vector<16x128xf32>
    %177 = arith.mulf %172, %176 : vector<16x128xf32>
    %c1_78 = arith.constant 1 : index
    %c2_79 = arith.constant 2 : index
    %c0_80 = arith.constant 0 : index
    %c0_81 = arith.constant 0 : index
    %178 = vector.load %arg1[%c1_78, %c2_79, %c0_80, %c0_81] : memref<2x4x16x128xbf16, #tpu.memory_space<vmem>>, vector<1x1x16x128xbf16>
    %179 = vector.shape_cast %178 : vector<1x1x16x128xbf16> to vector<16x128xbf16>
    %180 = arith.truncf %177 : vector<16x128xf32> to vector<16x128xbf16>
    %181 = tpu.concatenate %179, %180 in 1 : vector<16x128xbf16>, vector<16x128xbf16> -> vector<16x256xbf16>
    %cst_82 = arith.constant dense<0.000000e+00> : vector<16x128xf32>
    %182 = tpu.matmul %181, %124, %cst_82 {dimension_numbers = #tpu.dot_dimension_numbers<[1], [0], [0], [1], [0, 0, 1, 1], [], []>} : vector<16x256xbf16>, vector<256x128xbf16>, vector<16x128xf32> -> vector<16x128xf32>
    %183 = vector.broadcast %126 : vector<1x128xf32> to vector<16x128xf32>
    %184 = arith.addf %182, %183 : vector<16x128xf32>
    %185 = math.tanh %184 : vector<16x128xf32>
    %186 = arith.negf %184 : vector<16x128xf32>
    %187 = math.exp %186 : vector<16x128xf32>
    %cst_83 = arith.constant 1.000000e+00 : f32
    %188 = vector.broadcast %cst_83 : f32 to vector<16x128xf32>
    %189 = arith.addf %188, %187 : vector<16x128xf32>
    %190 = arith.divf %188, %189 : vector<16x128xf32>
    %191 = arith.select %131, %185, %190 : vector<16x128xi1>, vector<16x128xf32>
    %c104_i32_84 = arith.constant 104 : i32
    %192 = tpu.dynamic_rotate %191 by %c104_i32_84 dim 1 : vector<16x128xf32>, i32 -> vector<16x128xf32>
    %c80_i32_85 = arith.constant 80 : i32
    %193 = tpu.dynamic_rotate %191 by %c80_i32_85 dim 1 : vector<16x128xf32>, i32 -> vector<16x128xf32>
    %c56_i32_86 = arith.constant 56 : i32
    %194 = tpu.dynamic_rotate %191 by %c56_i32_86 dim 1 : vector<16x128xf32>, i32 -> vector<16x128xf32>
    %195 = arith.mulf %192, %175 : vector<16x128xf32>
    %196 = arith.mulf %191, %193 : vector<16x128xf32>
    %197 = arith.addf %195, %196 : vector<16x128xf32>
    %198 = math.tanh %197 : vector<16x128xf32>
    %199 = arith.mulf %194, %198 : vector<16x128xf32>
    %c1_87 = arith.constant 1 : index
    %c3_88 = arith.constant 3 : index
    %c0_89 = arith.constant 0 : index
    %c0_90 = arith.constant 0 : index
    %200 = vector.load %arg1[%c1_87, %c3_88, %c0_89, %c0_90] : memref<2x4x16x128xbf16, #tpu.memory_space<vmem>>, vector<1x1x16x128xbf16>
    %201 = vector.shape_cast %200 : vector<1x1x16x128xbf16> to vector<16x128xbf16>
    %202 = arith.truncf %199 : vector<16x128xf32> to vector<16x128xbf16>
    %203 = tpu.concatenate %201, %202 in 1 : vector<16x128xbf16>, vector<16x128xbf16> -> vector<16x256xbf16>
    %cst_91 = arith.constant dense<0.000000e+00> : vector<16x128xf32>
    %204 = tpu.matmul %203, %124, %cst_91 {dimension_numbers = #tpu.dot_dimension_numbers<[1], [0], [0], [1], [0, 0, 1, 1], [], []>} : vector<16x256xbf16>, vector<256x128xbf16>, vector<16x128xf32> -> vector<16x128xf32>
    %205 = vector.broadcast %126 : vector<1x128xf32> to vector<16x128xf32>
    %206 = arith.addf %204, %205 : vector<16x128xf32>
    %207 = math.tanh %206 : vector<16x128xf32>
    %208 = arith.negf %206 : vector<16x128xf32>
    %209 = math.exp %208 : vector<16x128xf32>
    %cst_92 = arith.constant 1.000000e+00 : f32
    %210 = vector.broadcast %cst_92 : f32 to vector<16x128xf32>
    %211 = arith.addf %210, %209 : vector<16x128xf32>
    %212 = arith.divf %210, %211 : vector<16x128xf32>
    %213 = arith.select %131, %207, %212 : vector<16x128xi1>, vector<16x128xf32>
    %c104_i32_93 = arith.constant 104 : i32
    %214 = tpu.dynamic_rotate %213 by %c104_i32_93 dim 1 : vector<16x128xf32>, i32 -> vector<16x128xf32>
    %c80_i32_94 = arith.constant 80 : i32
    %215 = tpu.dynamic_rotate %213 by %c80_i32_94 dim 1 : vector<16x128xf32>, i32 -> vector<16x128xf32>
    %c56_i32_95 = arith.constant 56 : i32
    %216 = tpu.dynamic_rotate %213 by %c56_i32_95 dim 1 : vector<16x128xf32>, i32 -> vector<16x128xf32>
    %217 = arith.mulf %214, %197 : vector<16x128xf32>
    %218 = arith.mulf %213, %215 : vector<16x128xf32>
    %219 = arith.addf %217, %218 : vector<16x128xf32>
    %220 = math.tanh %219 : vector<16x128xf32>
    %221 = arith.mulf %216, %220 : vector<16x128xf32>
    %222 = arith.truncf %221 : vector<16x128xf32> to vector<16x128xbf16>
    %c1_96 = arith.constant 1 : index
    %c0_97 = arith.constant 0 : index
    %c0_98 = arith.constant 0 : index
    %223 = vector.load %arg6[%c1_96, %c0_97, %c0_98] : memref<2x128x128xbf16, #tpu.memory_space<vmem>>, vector<1x128x128xbf16>
    %224 = vector.shape_cast %223 : vector<1x128x128xbf16> to vector<128x128xbf16>
    %cst_99 = arith.constant dense<0.000000e+00> : vector<16x128xf32>
    %225 = tpu.matmul %222, %224, %cst_99 {dimension_numbers = #tpu.dot_dimension_numbers<[1], [0], [0], [1], [0, 0, 1, 1], [], []>} : vector<16x128xbf16>, vector<128x128xbf16>, vector<16x128xf32> -> vector<16x128xf32>
    %c1_100 = arith.constant 1 : index
    %c0_101 = arith.constant 0 : index
    %c0_102 = arith.constant 0 : index
    %226 = vector.load %arg5[%c1_100, %c0_101, %c0_102] : memref<2x128x128xbf16, #tpu.memory_space<vmem>>, vector<1x128x128xbf16>
    %227 = vector.shape_cast %226 : vector<1x128x128xbf16> to vector<128x128xbf16>
    %cst_103 = arith.constant dense<0.000000e+00> : vector<16x128xf32>
    %228 = tpu.matmul %0, %227, %cst_103 {dimension_numbers = #tpu.dot_dimension_numbers<[1], [0], [0], [1], [0, 0, 1, 1], [], []>} : vector<16x128xbf16>, vector<128x128xbf16>, vector<16x128xf32> -> vector<16x128xf32>
    %229 = arith.addf %228, %225 : vector<16x128xf32>
    %c1_104 = arith.constant 1 : index
    %c0_105 = arith.constant 0 : index
    %c0_106 = arith.constant 0 : index
    %230 = vector.load %arg7[%c1_104, %c0_105, %c0_106] : memref<2x1x128xf32, #tpu.memory_space<vmem>>, vector<1x1x128xf32>
    %231 = vector.shape_cast %230 : vector<1x1x128xf32> to vector<1x128xf32>
    %232 = vector.broadcast %231 : vector<1x128xf32> to vector<16x128xf32>
    %233 = arith.addf %229, %232 : vector<16x128xf32>
    %cst_107 = arith.constant 5.000000e-01 : f32
    %234 = vector.broadcast %cst_107 : f32 to vector<16x128xf32>
    %235 = arith.mulf %234, %233 : vector<16x128xf32>
    %cst_108 = arith.constant 0.707106769 : f32
    %236 = vector.broadcast %cst_108 : f32 to vector<16x128xf32>
    %237 = arith.mulf %233, %236 : vector<16x128xf32>
    %238 = math.erf %237 : vector<16x128xf32>
    %cst_109 = arith.constant 1.000000e+00 : f32
    %239 = vector.broadcast %cst_109 : f32 to vector<16x128xf32>
    %240 = arith.addf %239, %238 : vector<16x128xf32>
    %241 = arith.mulf %235, %240 : vector<16x128xf32>
    %242 = arith.addf %122, %241 : vector<16x128xf32>
    %cst_110 = arith.constant dense<0.000000e+00> : vector<16xf32>
    %243 = vector.multi_reduction <add>, %242, %cst_110 [1] : vector<16x128xf32> to vector<16xf32>
    %244 = vector.shape_cast %243 : vector<16xf32> to vector<16x1xf32>
    %cst_111 = arith.constant 3.125000e-02 : f32
    %245 = vector.broadcast %cst_111 : f32 to vector<16x1xf32>
    %246 = arith.mulf %244, %245 : vector<16x1xf32>
    %247 = arith.mulf %242, %242 : vector<16x128xf32>
    %cst_112 = arith.constant dense<0.000000e+00> : vector<16xf32>
    %248 = vector.multi_reduction <add>, %247, %cst_112 [1] : vector<16x128xf32> to vector<16xf32>
    %249 = vector.shape_cast %248 : vector<16xf32> to vector<16x1xf32>
    %cst_113 = arith.constant 3.125000e-02 : f32
    %250 = vector.broadcast %cst_113 : f32 to vector<16x1xf32>
    %251 = arith.mulf %249, %250 : vector<16x1xf32>
    %252 = arith.mulf %246, %246 : vector<16x1xf32>
    %253 = arith.subf %251, %252 : vector<16x1xf32>
    %254 = vector.broadcast %246 : vector<16x1xf32> to vector<16x128xf32>
    %255 = arith.subf %242, %254 : vector<16x128xf32>
    %cst_114 = arith.constant 9.99999974E-6 : f32
    %256 = vector.broadcast %cst_114 : f32 to vector<16x1xf32>
    %257 = arith.addf %253, %256 : vector<16x1xf32>
    %258 = math.rsqrt %257 : vector<16x1xf32>
    %259 = vector.broadcast %258 : vector<16x1xf32> to vector<16x128xf32>
    %260 = arith.mulf %255, %259 : vector<16x128xf32>
    %c0_115 = arith.constant 0 : index
    %c0_116 = arith.constant 0 : index
    %261 = vector.load %arg8[%c0_115, %c0_116] : memref<1x128xf32, #tpu.memory_space<vmem>>, vector<1x128xf32>
    %262 = vector.broadcast %261 : vector<1x128xf32> to vector<16x128xf32>
    %263 = arith.mulf %260, %262 : vector<16x128xf32>
    %c0_117 = arith.constant 0 : index
    %c0_118 = arith.constant 0 : index
    %264 = vector.load %arg9[%c0_117, %c0_118] : memref<1x128xf32, #tpu.memory_space<vmem>>, vector<1x128xf32>
    %265 = vector.broadcast %264 : vector<1x128xf32> to vector<16x128xf32>
    %266 = arith.addf %263, %265 : vector<16x128xf32>
    %267 = arith.truncf %266 : vector<16x128xf32> to vector<16x128xbf16>
    %c0_119 = arith.constant 0 : index
    %c0_120 = arith.constant 0 : index
    %268 = vector.load %arg10[%c0_119, %c0_120] : memref<16x128xbf16, #tpu.memory_space<vmem>>, vector<16x128xbf16>
    tpu.vector_store %arg10[%c0_119, %c0_120], %267 {strides = array<i32>} : memref<16x128xbf16, #tpu.memory_space<vmem>>, vector<16x128xbf16>,
    return
  }
  func.func @transform_0(%arg0: i32) -> (i32, i32, i32, i32) {
    %c0_i32 = arith.constant 0 : i32
    %c0_i32_0 = arith.constant 0 : i32
    %c0_i32_1 = arith.constant 0 : i32
    %c0_i32_2 = arith.constant 0 : i32
    return %c0_i32, %c0_i32_0, %arg0, %c0_i32_1 : i32, i32, i32, i32
  }
  func.func @transform_1(%arg0: i32) -> (i32, i32) {
    %c0_i32 = arith.constant 0 : i32
    %c0_i32_0 = arith.constant 0 : i32
    return %arg0, %c0_i32 : i32, i32
  }
  func.func @transform_2(%arg0: i32) -> (i32, i32, i32) {
    %c0_i32 = arith.constant 0 : i32
    %c0_i32_0 = arith.constant 0 : i32
    %c0_i32_1 = arith.constant 0 : i32
    %c0_i32_2 = arith.constant 0 : i32
    return %c0_i32, %c0_i32_0, %c0_i32_1 : i32, i32, i32
  }
  func.func @transform_3(%arg0: i32) -> (i32, i32, i32) {
    %c0_i32 = arith.constant 0 : i32
    %c0_i32_0 = arith.constant 0 : i32
    %c0_i32_1 = arith.constant 0 : i32
    %c0_i32_2 = arith.constant 0 : i32
    return %c0_i32, %c0_i32_0, %c0_i32_1 : i32, i32, i32
  }
  func.func @transform_4(%arg0: i32) -> (i32, i32, i32) {
    %c0_i32 = arith.constant 0 : i32
    %c0_i32_0 = arith.constant 0 : i32
    %c0_i32_1 = arith.constant 0 : i32
    %c0_i32_2 = arith.constant 0 : i32
    return %c0_i32, %c0_i32_0, %c0_i32_1 : i32, i32, i32
  }
  func.func @transform_5(%arg0: i32) -> (i32, i32, i32) {
    %c0_i32 = arith.constant 0 : i32
    %c0_i32_0 = arith.constant 0 : i32
    %c0_i32_1 = arith.constant 0 : i32
    %c0_i32_2 = arith.constant 0 : i32
    return %c0_i32, %c0_i32_0, %c0_i32_1 : i32, i32, i32
  }
  func.func @transform_6(%arg0: i32) -> (i32, i32, i32) {
    %c0_i32 = arith.constant 0 : i32
    %c0_i32_0 = arith.constant 0 : i32
    %c0_i32_1 = arith.constant 0 : i32
    %c0_i32_2 = arith.constant 0 : i32
    return %c0_i32, %c0_i32_0, %c0_i32_1 : i32, i32, i32
  }
  func.func @transform_7(%arg0: i32) -> (i32, i32) {
    %c0_i32 = arith.constant 0 : i32
    %c0_i32_0 = arith.constant 0 : i32
    %c0_i32_1 = arith.constant 0 : i32
    return %c0_i32, %c0_i32_0 : i32, i32
  }
  func.func @transform_8(%arg0: i32) -> (i32, i32) {
    %c0_i32 = arith.constant 0 : i32
    %c0_i32_0 = arith.constant 0 : i32
    %c0_i32_1 = arith.constant 0 : i32
    return %c0_i32, %c0_i32_0 : i32, i32
  }
  func.func @transform_9(%arg0: i32) -> (i32, i32) {
    %c0_i32 = arith.constant 0 : i32
    %c0_i32_0 = arith.constant 0 : i32
    return %arg0, %c0_i32 : i32, i32
  }
}

</mosaic_0001>

<bundles_post_ra>
// kernel: tpu_custom_call.1
= control target key start
LH: loop header
LB: loop body
LE: loop exit
PB: predicated region body
PF: predicated region fallthrough
CT: control target
= control target key end

     0   :  { %14 = vsyncpa [#allocation3], 0  ;;  %s2990_s0 = inlined_call_operand.hbm [shape: bf16[2,4,16,128], index: 0, kind: input, shape index: {}]   ;;  %s2991_s1 = inlined_call_operand.hbm [shape: bf16[16,128], index: 1, kind: input, shape index: {}]   ;;  %s2992_s2 = inlined_call_operand.hbm [shape: bf16[2,256,128], index: 2, kind: input, shape index: {}]   ;;  %s2993_s3 = inlined_call_operand.vmem [shape: f32[2,1,128], index: 3, kind: input, shape index: {}]   ;;  %s2994_s4 = inlined_call_operand.hbm [shape: bf16[2,128,128], index: 4, kind: input, shape index: {}]   ;;  %s2995_s5 = inlined_call_operand.hbm [shape: bf16[2,128,128], index: 5, kind: input, shape index: {}]   ;;  %s2996_s6 = inlined_call_operand.vmem [shape: f32[2,1,128], index: 6, kind: input, shape index: {}]   ;;  %s2997_s7 = inlined_call_operand.vmem [shape: f32[1,128], index: 7, kind: input, shape index: {}]   ;;  %s2998_s8 = inlined_call_operand.vmem [shape: f32[1,128], index: 8, kind: input, shape index: {}]   ;;  %s2999_s9 = inlined_call_operand.hbm [shape: bf16[16,128], index: 9, kind: output, shape index: {}]  }
   0x1   :  { %15 = vsyncpa [#allocation6], 0 }
   0x2   :  { %16 = vsyncpa [#allocation9], 0 }
   0x3   :  { %17 = vsyncpa [#allocation4], 0  ;;  %s2406_s30 = smov [#allocation5]   ;;  %s2407_s11 = smov [#allocation8]  }
   0x4   :  { %s35_s10 = sshll.u32 %s2406_s30, 4  ;;  %s61_s12 = sshll.u32 %s2407_s11, 4  ;;  %s36_s10 = int_to_ptr.vmem [resolvable:$true] %s35_s10  ;;  %s2472_s12 = int_to_ptr.vmem [resolvable:$true] %s61_s12 }
   0x5   :  { %s2266_s15 = scalar_lea.hbm %s2991_s1, 128 }
   0x6   :  { %p2267_p0 = scmp.ne.s32.totalorder %s2991_s1, %s2266_s15  ;;  %p2270_p1 = scmp.lt.u32.totalorder %s2266_s15, %s2991_s1 }
   0x8   :  { %p2272_p2 = pnand %p2270_p1, %p2267_p0 }
   0xa   :  { %2275 = shalt.err (!%p2272_p2)
}
   0xb   :  { %s2276_s20 = scalar_lea.vmem %s36_s10, 128  ;;  %p2281_p4 = scmp.lt.s32.totalorder %s36_s10, %s36_s10 }
   0xc   :  { %p2277_p3 = scmp.ne.s32.totalorder %s36_s10, %s2276_s20  ;;  %p2282_p5 = scmp.lt.s32.totalorder %s2276_s20, %s2276_s20 }
   0xe   :  { %p2283_p6 = por %p2282_p5, %p2281_p4 }
  0x10   :  { %p2284_p7 = pnand %p2283_p6, %p2277_p3 }
  0x12   :  { %2287 = shalt.err (!%p2284_p7)
}
  0x13   :  { %s2408_s21 = smov 64   ;;  %s2409_s22 = smov 4  }
  0x14   :  { %41 = dma.hbm_to_vmem [thread:$0]  %s2991_s1, 128, %s36_s10, [#allocation6], %s2408_s21, %s2408_s21, %s2409_s22  }
  0x15   :  { %s2288_s27 = scalar_lea.hbm %s2994_s4, 2048 }
  0x16   :  { %p2289_p8 = scmp.ne.s32.totalorder %s2994_s4, %s2288_s27  ;;  %p2292_p9 = scmp.lt.u32.totalorder %s2288_s27, %s2994_s4 }
  0x18   :  { %p2294_p10 = pnand %p2292_p9, %p2289_p8 }
  0x1a   :  { %2297 = shalt.err (!%p2294_p10)
}
  0x1b   :  { %s2298_s13 = scalar_lea.vmem %s2472_s12, 2048  ;;  %p2303_p12 = scmp.lt.s32.totalorder %s2472_s12, %s2472_s12 }
  0x1c   :  { %p2299_p11 = scmp.ne.s32.totalorder %s2472_s12, %s2298_s13  ;;  %p2304_p13 = scmp.lt.s32.totalorder %s2298_s13, %s2298_s13 }
  0x1e   :  { %p2305_p0 = por %p2304_p13, %p2303_p12 }
  0x20   :  { %p2306_p1 = pnand %p2305_p0, %p2299_p11 }
  0x22   :  { %2309 = shalt.err (!%p2306_p1)
}
  0x23   :  { %67 = dma.hbm_to_vmem [thread:$0]  %s2994_s4, 2048, %s2472_s12, [#allocation9], %s2408_s21, %s2408_s21, %s2409_s22  }
  0x24   :  { %s2410_s14 = smov [#allocation2]   ;;  %s2411_s16 = smov [#allocation7]  }
  0x25   :  { %s23_s15 = sshll.u32 %s2410_s14, 4  ;;  %s47_s17 = sshll.u32 %s2411_s16, 4  ;;  %s24_s15 = int_to_ptr.vmem [resolvable:$true] %s23_s15  ;;  %s2509_s17 = int_to_ptr.vmem [resolvable:$true] %s47_s17 }
  0x26   :  { %s2310_s20 = scalar_lea.hbm %s2990_s0, 1024 }
  0x27   :  { %p2311_p2 = scmp.ne.s32.totalorder %s2990_s0, %s2310_s20  ;;  %p2314_p3 = scmp.lt.u32.totalorder %s2310_s20, %s2990_s0 }
  0x29   :  { %p2316_p4 = pnand %p2314_p3, %p2311_p2 }
  0x2b   :  { %2319 = shalt.err (!%p2316_p4)
}
  0x2c   :  { %s2320_s4 = scalar_lea.vmem %s24_s15, 1024  ;;  %p2325_p6 = scmp.lt.s32.totalorder %s24_s15, %s24_s15 }
  0x2d   :  { %p2321_p5 = scmp.ne.s32.totalorder %s24_s15, %s2320_s4  ;;  %p2326_p7 = scmp.lt.s32.totalorder %s2320_s4, %s2320_s4 }
  0x2f   :  { %p2327_p8 = por %p2326_p7, %p2325_p6 }
  0x31   :  { %p2328_p9 = pnand %p2327_p8, %p2321_p5 }
  0x33   :  { %2331 = shalt.err (!%p2328_p9)
}
  0x34   :  { %29 = dma.hbm_to_vmem [thread:$0]  %s2990_s0, 1024, %s24_s15, [#allocation3], %s2408_s21, %s2408_s21, %s2409_s22  }
  0x35   :  { %s2332_s30 = scalar_lea.hbm %s2992_s2, 4096 }
  0x36   :  { %p2333_p10 = scmp.ne.s32.totalorder %s2992_s2, %s2332_s30  ;;  %p2336_p11 = scmp.lt.u32.totalorder %s2332_s30, %s2992_s2 }
  0x38   :  { %p2338_p12 = pnand %p2336_p11, %p2333_p10 }
  0x3a   :  { %2341 = shalt.err (!%p2338_p12)
}
  0x3b   :  { %s2342_s14 = scalar_lea.vmem %s2509_s17, 4096  ;;  %p2347_p0 = scmp.lt.s32.totalorder %s2509_s17, %s2509_s17 }
  0x3c   :  { %p2343_p13 = scmp.ne.s32.totalorder %s2509_s17, %s2342_s14  ;;  %p2348_p1 = scmp.lt.s32.totalorder %s2342_s14, %s2342_s14 }
  0x3e   :  { %p2349_p2 = por %p2348_p1, %p2347_p0 }
  0x40   :  { %p2350_p3 = pnand %p2349_p2, %p2343_p13 }
  0x42   :  { %2353 = shalt.err (!%p2350_p3)
}
  0x43   :  { %53 = dma.hbm_to_vmem [thread:$0]  %s2992_s2, 4096, %s2509_s17, [#allocation6], %s2408_s21, %s2408_s21, %s2409_s22  }
  0x44   :  { %s2412_s16 = smov [#allocation10]   ;;  %s2354_s23 = scalar_lea.hbm %s2995_s5, 2048 }
  0x45   :  { %s73_s18 = sshll.u32 %s2412_s16, 4  ;;  %p2355_p4 = scmp.ne.s32.totalorder %s2995_s5, %s2354_s23  ;;  %s74_s18 = int_to_ptr.vmem [resolvable:$true] %s73_s18 }
  0x46   :  { %p2358_p5 = scmp.lt.u32.totalorder %s2354_s23, %s2995_s5 }
  0x48   :  { %p2360_p6 = pnand %p2358_p5, %p2355_p4 }
  0x4a   :  { %2363 = shalt.err (!%p2360_p6)
}
  0x4b   :  { %s2364_s12 = scalar_lea.vmem %s74_s18, 2048  ;;  %p2369_p8 = scmp.lt.s32.totalorder %s74_s18, %s74_s18 }
  0x4c   :  { %p2365_p7 = scmp.ne.s32.totalorder %s74_s18, %s2364_s12  ;;  %p2370_p9 = scmp.lt.s32.totalorder %s2364_s12, %s2364_s12 }
  0x4e   :  { %p2371_p10 = por %p2370_p9, %p2369_p8 }
  0x50   :  { %p2372_p11 = pnand %p2371_p10, %p2365_p7 }
  0x52   :  { %2375 = shalt.err (!%p2372_p11)
}
  0x53   :  { %79 = dma.hbm_to_vmem [thread:$0]  %s2995_s5, 2048, %s74_s18, [#allocation9], %s2408_s21, %s2408_s21, %s2409_s22  }
  0x54   :  { %2398 = dma.done.wait [#allocation3], 1024  }
  0x55   :  { %2399 = vsyncadd [#allocation3], 4294966272 }
  0x56   :  { %2400 = dma.done.wait [#allocation6], 4224  }
  0x57   :  { %2401 = vsyncadd [#allocation6], 4294963072 }
  0x58   :  { %2402 = dma.done.wait [#allocation9], 4096  }
  0x59   :  { %2403 = vsyncadd [#allocation9], 4294963200  ;;  %v2413_v0 = vmov 0   ;;  %v2053_v1 = vld [vmem:[#allocation7 + $0x40] sm:$0xff]   ;;  %v2564_v3 = vld [vmem:[#allocation7 + $0x48] sm:$0xff]   ;;  %v104_v30 = vlaneseq  ;;  %s2414_s28 = smov 96  }
  0x5a   :  { %284 = vmatprep.mubr.bf16.mxu0 %v2413_v0  ;;  %v2562_v2 = vld [vmem:[#allocation7] sm:$0xff]   ;;  %1745 = vmatprep.subr.bf16.mxu0 %v2053_v1  ;;  %v2567_v4 = vld [vmem:[#allocation7 + $0x8] sm:$0xff]   ;;  %v2571_v5 = vld [vmem:[#allocation7 + $0x50] sm:$0xff]   ;;  %s2415_s29 = smov 112   ;;  %s2416_s30 = smov 80   ;;  %vm2418_vm3 = vmmov 0  }
  0x5b   :  { %1767 = vmatprep.subr.bf16.mxu1 %v2053_v1  ;;  %1746 = vmatpush3.bf16.msra.mxu0 %v2562_v2  ;;  %v2575_v6 = vld [vmem:[#allocation7 + $0x10] sm:$0xff]   ;;  %v2579_v7 = vld [vmem:[#allocation7 + $0x58] sm:$0xff]   ;;  %v2587_v9 = vld [vmem:[#allocation7 + $0x60] sm:$0xff]   ;;  %v2644_v34 = vand.u32 127, %v104_v30  ;;  %s2420_s1 = smov 56   ;;  %s2421_s20 = smov [#allocation11]  }
  0x5c   :  { %1768 = vmatpush3.bf16.msra.mxu1 %v2562_v2  ;;  %1747 = vmatprep.subr.bf16.mxu0 %v2564_v3  ;;  %v2583_v8 = vld [vmem:[#allocation7 + $0x18] sm:$0xff]   ;;  %v2591_v10 = vld [vmem:[#allocation7 + $0x20] sm:$0xff]   ;;  %v2595_v11 = vld [vmem:[#allocation7 + $0x68] sm:$0xff]   ;;  %s1625_s23 = sshll.u32 %s2421_s20, 4  ;;  %s1626_s23 = int_to_ptr.vmem [resolvable:$true] %s1625_s23 }
  0x5d   :  { %1769 = vmatprep.subr.bf16.mxu1 %v2564_v3  ;;  %v2598_v12 = vld [vmem:[#allocation7 + $0x28] sm:$0xff]   ;;  %v2600_v13 = vld [vmem:[#allocation7 + $0x70] sm:$0xff]   ;;  %v2608_v15 = vld [vmem:[#allocation7 + $0x78] sm:$0xff]   ;;  %vm139_vm0 = vcmp.ge.s32.totalorder %v2644_v34, 32  ;;  %vm140_vm1 = vcmp.lt.s32.totalorder %v2644_v34, 48  ;;  %vm871_vm4 = vcmp.ge.s32.totalorder %v2644_v34, 48  ;;  %p2381_p13 = scmp.lt.s32.totalorder %s1626_s23, %s1626_s23 }
  0x5e   :  { %v2606_v14 = vld [vmem:[#allocation7 + $0x30] sm:$0xff]   ;;  %v2614_v16 = vld [vmem:[#allocation7 + $0x38] sm:$0xff]   ;;  %vm2648_vm2 = vmand %vm139_vm0, %vm140_vm1  ;;  %vm872_vm5 = vcmp.lt.s32.totalorder %v2644_v34, 72  ;;  %s2376_s24 = scalar_lea.vmem %s1626_s23, 128 }
  0x5f   :  { %1748 = vmatpush3.bf16.msra.mxu0 %v2567_v4  ;;  %v2069_v17 = vld [vmem:[#allocation2] sm:$0xff]   ;;  %v2070_v58 = vld [vmem:[#allocation2 + $0x8] sm:$0xff]   ;;  %vm2860_vm6 = vmand %vm871_vm4, %vm872_vm5  ;;  %p2377_p12 = scmp.ne.s32.totalorder %s1626_s23, %s2376_s24  ;;  %p2382_p0 = scmp.lt.s32.totalorder %s2376_s24, %s2376_s24 }
  0x60   :  { %1770 = vmatpush3.bf16.msra.mxu1 %v2567_v4  ;;  %1749 = vmatprep.subr.bf16.mxu0 %v2571_v5  ;;  %v2640_v19 = vld [vmem:[%s2993_s3] ss:$0 sm:$0xff] }
  0x61   :  { %1771 = vmatprep.subr.bf16.mxu1 %v2571_v5  ;;  %v2087_v35 = vld [vmem:[#allocation10 + $0x38] sm:$0xff]   ;;  %p2383_p1 = por %p2382_p0, %p2381_p13 }
  0x63   :  { %1750 = vmatpush3.bf16.msra.mxu0 %v2575_v6  ;;  %p2384_p2 = pnand %p2383_p1, %p2377_p12 }
  0x64   :  { %1772 = vmatpush3.bf16.msra.mxu1 %v2575_v6  ;;  %1751 = vmatprep.subr.bf16.mxu0 %v2579_v7 }
  0x65   :  { %1773 = vmatprep.subr.bf16.mxu1 %v2579_v7 }
  0x67   :  { %1752 = vmatpush3.bf16.msra.mxu0 %v2583_v8 }
  0x68   :  { %1774 = vmatpush3.bf16.msra.mxu1 %v2583_v8  ;;  %1753 = vmatprep.subr.bf16.mxu0 %v2587_v9 }
  0x69   :  { %1775 = vmatprep.subr.bf16.mxu1 %v2587_v9 }
  0x6b   :  { %1754 = vmatpush3.bf16.msra.mxu0 %v2591_v10 }
  0x6c   :  { %1776 = vmatpush3.bf16.msra.mxu1 %v2591_v10  ;;  %1755 = vmatprep.subr.bf16.mxu0 %v2595_v11 }
  0x6d   :  { %1777 = vmatprep.subr.bf16.mxu1 %v2595_v11 }
  0x6f   :  { %1756 = vmatpush3.bf16.msra.mxu0 %v2598_v12 }
  0x70   :  { %1778 = vmatpush3.bf16.msra.mxu1 %v2598_v12  ;;  %1757 = vmatprep.subr.bf16.mxu0 %v2600_v13 }
  0x71   :  { %1779 = vmatprep.subr.bf16.mxu1 %v2600_v13 }
  0x73   :  { %1758 = vmatpush3.bf16.msra.mxu0 %v2606_v14 }
  0x74   :  { %1780 = vmatpush3.bf16.msra.mxu1 %v2606_v14  ;;  %1759 = vmatprep.subr.bf16.mxu0 %v2608_v15 }
  0x75   :  { %1781 = vmatprep.subr.bf16.mxu1 %v2608_v15 }
  0x77   :  { %1760 = vmatpush3.bf16.msra.mxu0 %v2614_v16 }
  0x78   :  { %1782 = vmatpush3.bf16.msra.mxu1 %v2614_v16  ;;  %1789 = vmatprep.subr.bf16.mxu0 %v2053_v1 }
  0x79   :  { %1811 = vmatprep.subr.bf16.mxu1 %v2053_v1 }
  0x7a   :  { %285 = vmatmul.mubr.bf16.vlgmr.msra.gmra.mrb[0].mxu0 %v2069_v17 }
  0x7b   :  { %1790 = vmatpush3.bf16.msra.mxu0 %v2562_v2 }
  0x7c   :  { %1791 = vmatprep.subr.bf16.mxu0 %v2564_v3 }
  0x7f   :  { %1792 = vmatpush3.bf16.msra.mxu0 %v2567_v4 }
  0x80   :  { %1793 = vmatprep.subr.bf16.mxu0 %v2571_v5 }
  0x83   :  { %1794 = vmatpush3.bf16.msra.mxu0 %v2575_v6 }
  0x84   :  { %1795 = vmatprep.subr.bf16.mxu0 %v2579_v7 }
  0x87   :  { %1796 = vmatpush3.bf16.msra.mxu0 %v2583_v8 }
  0x88   :  { %1797 = vmatprep.subr.bf16.mxu0 %v2587_v9 }
  0x8b   :  { %1798 = vmatpush3.bf16.msra.mxu0 %v2591_v10 }
  0x8c   :  { %1799 = vmatprep.subr.bf16.mxu0 %v2595_v11 }
  0x8f   :  { %1800 = vmatpush3.bf16.msra.mxu0 %v2598_v12 }
  0x90   :  { %1801 = vmatprep.subr.bf16.mxu0 %v2600_v13 }
  0x93   :  { %1802 = vmatpush3.bf16.msra.mxu0 %v2606_v14 }
  0x94   :  { %1803 = vmatprep.subr.bf16.mxu0 %v2608_v15 }
  0x97   :  { %1804 = vmatpush3.bf16.msra.mxu0 %v2614_v16 }
 0x14d   :  { %v1761_v18 = vpop.f32.mrb[0].mxu0 }
 0x14e   :  { %v1762_v20 = vpop.f32.mrb[1].mxu0 }
 0x14f   :  { %v1763_v21 = vadd.f32 %v1762_v20, %v1761_v18  ;;  %v1764_v22 = vpop.f32.mrb[2].mxu0 }
 0x150   :  { %v1765_v23 = vpop.f32.mrb[3].mxu0 }
 0x151   :  { %v287_v24 = vadd.f32 %v1763_v21, %v2640_v19  ;;  %v1766_v25 = vadd.f32 %v1765_v23, %v1764_v22 }
 0x153   :  { %v1657_v26 = vmul.f32 -1.442695, %v287_v24  ;;  %v290_v27 = vadd.f32 %v1766_v25, %v2640_v19 }
 0x155   :  { %2126 = vpow2.f32 %v1657_v26  ;;  %v1658_v28 = vmul.f32 -1.442695, %v290_v27 }
 0x157   :  { %2128 = vpow2.f32 %v1658_v28 }
 0x158   :  { %2130 = vtanh.f32 %v287_v24 }
 0x15f   :  { %v2127_v29 = vpop.eup %2126 }
 0x160   :  { %v301_v31 = vadd.f32 1.0, %v2127_v29 }
 0x161   :  { %v2129_v32 = vpop.eup %2128 }
 0x162   :  { %2132 = vrcp.f32 %v301_v31  ;;  %v302_v33 = vadd.f32 1.0, %v2129_v32  ;;  %v2131_v36 = vpop.eup %2130 }
 0x164   :  { %2134 = vrcp.f32 %v302_v33 }
 0x165   :  { %2136 = vtanh.f32 %v290_v27 }
 0x16c   :  { %v2133_v37 = vpop.eup %2132 }
 0x16d   :  { %v307_v38 = vsel %vm2648_vm2, %v2131_v36, %v2133_v37  ;;  %v2071_v36 = vld [vmem:[#allocation2 + $0x10] sm:$0xff]  }
 0x16e   :  { %v2135_v39 = vpop.eup %2134  ;;  %313 = vrot.lane.b32.xlu1 %v307_v38, %s2414_s28  ;;  %309 = vrot.lane.b32.xlu0 %v307_v38, %s2415_s29 }
 0x16f   :  { %v2137_v40 = vpop.eup %2136 }
 0x170   :  { %v308_v41 = vsel %vm2648_vm2, %v2137_v40, %v2135_v39 }
 0x172   :  { %315 = vrot.lane.b32.xlu1 %v308_v41, %s2414_s28  ;;  %311 = vrot.lane.b32.xlu0 %v308_v41, %s2415_s29 }
 0x176   :  { %319 = vrot.lane.b32.xlu1 %v308_v41, %s2416_s30  ;;  %317 = vrot.lane.b32.xlu0 %v307_v38, %s2416_s30 }
 0x1e0   :  { %v314_v42 = vpop.permute.xlu1 %313  ;;  %v310_v43 = vpop.permute.xlu0 %309 }
 0x1e1   :  { %v323_v44 = vmul.f32 %v314_v42, %v307_v38  ;;  %v321_v45 = vmul.f32 0.0, %v310_v43 }
 0x1e3   :  { %v2662_v46 = vadd.f32 %v323_v44, %v321_v45 }
 0x1e4   :  { %v316_v47 = vpop.permute.xlu1 %315  ;;  %v312_v48 = vpop.permute.xlu0 %311 }
 0x1e5   :  { %v324_v49 = vmul.f32 %v316_v47, %v308_v41  ;;  %v322_v50 = vmul.f32 0.0, %v312_v48  ;;  %2138 = vtanh.f32 %v2662_v46 }
 0x1e7   :  { %v2665_v51 = vadd.f32 %v324_v49, %v322_v50 }
 0x1e8   :  { %v320_v54 = vpop.permute.xlu1 %319  ;;  %v318_v55 = vpop.permute.xlu0 %317 }
 0x1e9   :  { %2140 = vtanh.f32 %v2665_v51 }
 0x1ef   :  { %v2139_v52 = vpop.eup %2138 }
 0x1f0   :  { %v329_v57 = vmul.f32 %v2139_v52, %v318_v55 }
 0x1f3   :  { %v2141_v53 = vpop.eup %2140 }
 0x1f4   :  { %v330_v56 = vmul.f32 %v2141_v53, %v320_v54 }
 0x1f6   :  { %v334_v59 = vpack.c.bf16 %v330_v56, %v329_v57 }
 0x1f8   :  { %373 = vmatprep.mubr.bf16.mxu1 %v334_v59 }
 0x1f9   :  { %374 = vmatmul.mubr.bf16.vlgmr.msra.gmra.mrb[0].mxu1 %v2070_v58 }
 0x1fa   :  { %1812 = vmatpush3.bf16.msra.mxu1 %v2562_v2 }
 0x1fb   :  { %1813 = vmatprep.subr.bf16.mxu1 %v2564_v3 }
 0x1fe   :  { %1814 = vmatpush3.bf16.msra.mxu1 %v2567_v4 }
 0x1ff   :  { %1815 = vmatprep.subr.bf16.mxu1 %v2571_v5 }
 0x202   :  { %1816 = vmatpush3.bf16.msra.mxu1 %v2575_v6 }
 0x203   :  { %1817 = vmatprep.subr.bf16.mxu1 %v2579_v7 }
 0x206   :  { %1818 = vmatpush3.bf16.msra.mxu1 %v2583_v8 }
 0x207   :  { %1819 = vmatprep.subr.bf16.mxu1 %v2587_v9 }
 0x20a   :  { %1820 = vmatpush3.bf16.msra.mxu1 %v2591_v10 }
 0x20b   :  { %1821 = vmatprep.subr.bf16.mxu1 %v2595_v11 }
 0x20e   :  { %1822 = vmatpush3.bf16.msra.mxu1 %v2598_v12 }
 0x20f   :  { %1823 = vmatprep.subr.bf16.mxu1 %v2600_v13 }
 0x212   :  { %1824 = vmatpush3.bf16.msra.mxu1 %v2606_v14 }
 0x213   :  { %1825 = vmatprep.subr.bf16.mxu1 %v2608_v15 }
 0x216   :  { %1826 = vmatpush3.bf16.msra.mxu1 %v2614_v16 }
 0x2cc   :  { %v1783_v60 = vpop.f32.mrb[0].mxu1 }
 0x2cd   :  { %v1784_v61 = vpop.f32.mrb[1].mxu1 }
 0x2ce   :  { %v1785_v62 = vadd.f32 %v1784_v61, %v1783_v60  ;;  %v1786_v63 = vpop.f32.mrb[2].mxu1 }
 0x2cf   :  { %v1787_v1 = vpop.f32.mrb[3].mxu1 }
 0x2d0   :  { %v376_v2 = vadd.f32 %v1785_v62, %v2640_v19  ;;  %v1788_v3 = vadd.f32 %v1787_v1, %v1786_v63 }
 0x2d2   :  { %v1660_v4 = vmul.f32 -1.442695, %v376_v2  ;;  %v379_v5 = vadd.f32 %v1788_v3, %v2640_v19 }
 0x2d4   :  { %2142 = vpow2.f32 %v1660_v4  ;;  %v1661_v6 = vmul.f32 -1.442695, %v379_v5 }
 0x2d6   :  { %2144 = vpow2.f32 %v1661_v6 }
 0x2d7   :  { %2146 = vtanh.f32 %v376_v2 }
 0x2de   :  { %v2143_v7 = vpop.eup %2142 }
 0x2df   :  { %v390_v8 = vadd.f32 1.0, %v2143_v7 }
 0x2e0   :  { %v2145_v9 = vpop.eup %2144 }
 0x2e1   :  { %2148 = vrcp.f32 %v390_v8  ;;  %v391_v10 = vadd.f32 1.0, %v2145_v9  ;;  %v2147_v11 = vpop.eup %2146 }
 0x2e2   :  { %2150 = vtanh.f32 %v379_v5 }
 0x2e3   :  { %2152 = vrcp.f32 %v391_v10 }
 0x2eb   :  { %v2149_v12 = vpop.eup %2148 }
 0x2ec   :  { %v2151_v13 = vpop.eup %2150  ;;  %v396_v14 = vsel %vm2648_vm2, %v2147_v11, %v2149_v12  ;;  %v2072_v11 = vld [vmem:[#allocation2 + $0x18] sm:$0xff]  }
 0x2ed   :  { %v2153_v15 = vpop.eup %2152  ;;  %398 = vrot.lane.b32.xlu0 %v396_v14, %s2415_s29 }
 0x2ee   :  { %v397_v16 = vsel %vm2648_vm2, %v2151_v13, %v2153_v15  ;;  %v2073_v13 = vld [vmem:[#allocation10] sm:$0xff]   ;;  %v2417_v15 = vmov 0.0  }
 0x2ef   :  { %400 = vrot.lane.b32.xlu1 %v397_v16, %s2415_s29  ;;  %1957 = vmatprep.subr.bf16.mxu0 %v2417_v15 }
 0x2f0   :  { %1977 = vmatprep.subr.bf16.mxu1 %v2417_v15 }
 0x2f1   :  { %402 = vrot.lane.b32.xlu0 %v396_v14, %s2414_s28 }
 0x2f3   :  { %404 = vrot.lane.b32.xlu1 %v397_v16, %s2414_s28 }
 0x2f5   :  { %406 = vrot.lane.b32.xlu0 %v396_v14, %s2416_s30 }
 0x2f7   :  { %408 = vrot.lane.b32.xlu1 %v397_v16, %s2416_s30 }
 0x35f   :  { %v399_v17 = vpop.permute.xlu0 %398 }
 0x360   :  { %v410_v21 = vmul.f32 %v399_v17, %v2662_v46  ;;  %v2076_v17 = vld [vmem:[#allocation8 + $0x8] sm:$0xff]  }
 0x361   :  { %v401_v18 = vpop.permute.xlu1 %400 }
 0x362   :  { %v411_v24 = vmul.f32 %v401_v18, %v2665_v51 }
 0x363   :  { %v403_v20 = vpop.permute.xlu0 %402 }
 0x364   :  { %v412_v22 = vmul.f32 %v403_v20, %v396_v14  ;;  %v2074_v14 = vld [vmem:[#allocation8] sm:$0xff]  }
 0x365   :  { %v405_v23 = vpop.permute.xlu1 %404 }
 0x366   :  { %v414_v25 = vadd.f32 %v412_v22, %v410_v21  ;;  %v413_v26 = vmul.f32 %v405_v23, %v397_v16  ;;  %v2075_v16 = vld [vmem:[#allocation10 + $0x8] sm:$0xff]  }
 0x367   :  { %v407_v30 = vpop.permute.xlu0 %406 }
 0x368   :  { %2154 = vtanh.f32 %v414_v25  ;;  %v415_v27 = vadd.f32 %v413_v26, %v411_v24 }
 0x369   :  { %v409_v31 = vpop.permute.xlu1 %408 }
 0x36a   :  { %2156 = vtanh.f32 %v415_v27 }
 0x372   :  { %v2155_v28 = vpop.eup %2154 }
 0x373   :  { %v418_v32 = vmul.f32 %v2155_v28, %v407_v30 }
 0x374   :  { %v2157_v29 = vpop.eup %2156 }
 0x375   :  { %v419_v33 = vmul.f32 %v2157_v29, %v409_v31 }
 0x377   :  { %v423_v37 = vpack.c.bf16 %v419_v33, %v418_v32  ;;  %v2077_v32 = vld [vmem:[#allocation10 + $0x10] sm:$0xff]  }
 0x379   :  { %462 = vmatprep.mubr.bf16.mxu0 %v423_v37  ;;  %v2079_v37 = vld [vmem:[#allocation10 + $0x18] sm:$0xff]  }
 0x37a   :  { %463 = vmatmul.mubr.bf16.vlgmr.msra.gmra.mrb[4].mxu0 %v2071_v36  ;;  %v2078_v36 = vld [vmem:[#allocation8 + $0x10] sm:$0xff]  }
 0x37b   :  { %1958 = vmatpush3.bf16.msra.mxu0 %v2073_v13  ;;  %1973 = vmatprep.mubr.msk.bf16.mxu0 %vm2418_vm3, %v2417_v15 }
 0x37c   :  { %1959 = vmatprep.subr.bf16.mxu0 %v2417_v15 }
 0x37f   :  { %1960 = vmatpush3.bf16.msra.mxu0 %v2075_v16 }
 0x380   :  { %1961 = vmatprep.subr.bf16.mxu0 %v2417_v15 }
 0x383   :  { %1962 = vmatpush3.bf16.msra.mxu0 %v2077_v32 }
 0x384   :  { %1963 = vmatprep.subr.bf16.mxu0 %v2417_v15 }
 0x387   :  { %1964 = vmatpush3.bf16.msra.mxu0 %v2079_v37  ;;  %v2854_v37 = vld [vmem:[%s2993_s3 + $0x1] ss:$0 sm:$0xff]  ;;  %s2419_s3 = smov 104  }
 0x388   :  { %1965 = vmatprep.subr.bf16.mxu0 %v2417_v15 }
 0x44d   :  { %v1805_v38 = vpop.f32.mrb[4].mxu0 }
 0x44e   :  { %v1806_v39 = vpop.f32.mrb[5].mxu0 }
 0x44f   :  { %v1807_v40 = vadd.f32 %v1806_v39, %v1805_v38  ;;  %v1808_v41 = vpop.f32.mrb[6].mxu0  ;;  %v2081_v38 = vld [vmem:[#allocation10 + $0x20] sm:$0xff]  }
 0x450   :  { %v1809_v42 = vpop.f32.mrb[7].mxu0  ;;  %v2082_v39 = vld [vmem:[#allocation8 + $0x20] sm:$0xff]   ;;  %1966 = vmatpush3.bf16.msra.mxu0 %v2081_v38 }
 0x451   :  { %v465_v43 = vadd.f32 %v1807_v40, %v2640_v19  ;;  %v1810_v44 = vadd.f32 %v1809_v42, %v1808_v41  ;;  %1967 = vmatprep.subr.bf16.mxu0 %v2417_v15 }
 0x453   :  { %v1663_v45 = vmul.f32 -1.442695, %v465_v43  ;;  %v468_v46 = vadd.f32 %v1810_v44, %v2640_v19  ;;  %v2083_v44 = vld [vmem:[#allocation10 + $0x28] sm:$0xff]  }
 0x454   :  { %1968 = vmatpush3.bf16.msra.mxu0 %v2083_v44 }
 0x455   :  { %2158 = vpow2.f32 %v1663_v45  ;;  %v1664_v47 = vmul.f32 -1.442695, %v468_v46  ;;  %1969 = vmatprep.subr.bf16.mxu0 %v2417_v15 }
 0x457   :  { %2160 = vpow2.f32 %v1664_v47 }
 0x458   :  { %2162 = vtanh.f32 %v465_v43 }
 0x45f   :  { %v2159_v48 = vpop.eup %2158 }
 0x460   :  { %v479_v49 = vadd.f32 1.0, %v2159_v48  ;;  %v2085_v48 = vld [vmem:[#allocation10 + $0x30] sm:$0xff]  }
 0x461   :  { %v2161_v50 = vpop.eup %2160  ;;  %1970 = vmatpush3.bf16.msra.mxu0 %v2085_v48 }
 0x462   :  { %2164 = vrcp.f32 %v479_v49  ;;  %v480_v51 = vadd.f32 1.0, %v2161_v50  ;;  %v2163_v52 = vpop.eup %2162  ;;  %v2086_v49 = vld [vmem:[#allocation8 + $0x30] sm:$0xff]   ;;  %1971 = vmatprep.subr.bf16.mxu0 %v2417_v15  ;;  %v2088_v50 = vld [vmem:[#allocation8 + $0x38] sm:$0xff]  }
 0x463   :  { %2166 = vtanh.f32 %v468_v46  ;;  %v2084_v46 = vld [vmem:[#allocation8 + $0x28] sm:$0xff]  }
 0x464   :  { %2168 = vrcp.f32 %v480_v51  ;;  %v2753_v51 = vld [vmem:[#allocation7 + $0xc0] sm:$0xff]  }
 0x465   :  { %1972 = vmatpush3.bf16.msra.mxu0 %v2087_v35  ;;  %v2125_v35 = vld [vmem:[#allocation10 + $0x78] sm:$0xff]  }
 0x466   :  { %1851 = vmatprep.subr.bf16.mxu0 %v2753_v51 }
 0x46c   :  { %v2165_v53 = vpop.eup %2164 }
 0x46d   :  { %v2167_v54 = vpop.eup %2166  ;;  %v485_v55 = vsel %vm2648_vm2, %v2163_v52, %v2165_v53  ;;  %v2759_v52 = vld [vmem:[#allocation5] sm:$0xff]   ;;  %v2762_v53 = vld [vmem:[#allocation7 + $0x80] sm:$0xff]  }
 0x46e   :  { %v2169_v56 = vpop.eup %2168  ;;  %487 = vrot.lane.b32.xlu0 %v485_v55, %s2415_s29 }
 0x46f   :  { %v486_v57 = vsel %vm2648_vm2, %v2167_v54, %v2169_v56  ;;  %v2766_v54 = vld [vmem:[#allocation7 + $0xc8] sm:$0xff]   ;;  %v2772_v56 = vld [vmem:[#allocation7 + $0xd0] sm:$0xff]  }
 0x470   :  { %489 = vrot.lane.b32.xlu1 %v486_v57, %s2415_s29 }
 0x472   :  { %491 = vrot.lane.b32.xlu0 %v485_v55, %s2414_s28 }
 0x474   :  { %493 = vrot.lane.b32.xlu1 %v486_v57, %s2414_s28 }
 0x476   :  { %495 = vrot.lane.b32.xlu0 %v485_v55, %s2416_s30 }
 0x478   :  { %497 = vrot.lane.b32.xlu1 %v486_v57, %s2416_s30 }
 0x4e0   :  { %v488_v58 = vpop.permute.xlu0 %487 }
 0x4e1   :  { %v499_v61 = vmul.f32 %v488_v58, %v414_v25  ;;  %v2778_v58 = vld [vmem:[#allocation7 + $0xd8] sm:$0xff]  }
 0x4e2   :  { %v490_v59 = vpop.permute.xlu1 %489 }
 0x4e3   :  { %v500_v1 = vmul.f32 %v490_v59, %v415_v27  ;;  %v2782_v59 = vld [vmem:[#allocation7 + $0x98] sm:$0xff]  }
 0x4e4   :  { %v492_v60 = vpop.permute.xlu0 %491 }
 0x4e5   :  { %v501_v62 = vmul.f32 %v492_v60, %v485_v55  ;;  %v2770_v55 = vld [vmem:[#allocation7 + $0x88] sm:$0xff]   ;;  %v2784_v60 = vld [vmem:[#allocation7 + $0xe0] sm:$0xff]  }
 0x4e6   :  { %v494_v63 = vpop.permute.xlu1 %493 }
 0x4e7   :  { %v2709_v2 = vadd.f32 %v501_v62, %v499_v61  ;;  %v502_v3 = vmul.f32 %v494_v63, %v486_v57  ;;  %v2776_v57 = vld [vmem:[#allocation7 + $0x90] sm:$0xff]   ;;  %v2788_v61 = vld [vmem:[#allocation7 + $0xa0] sm:$0xff]   ;;  %v2790_v62 = vld [vmem:[#allocation7 + $0xe8] sm:$0xff]  }
 0x4e8   :  { %v496_v7 = vpop.permute.xlu0 %495  ;;  %v2794_v63 = vld [vmem:[#allocation7 + $0xa8] sm:$0xff]  }
 0x4e9   :  { %2170 = vtanh.f32 %v2709_v2  ;;  %v2712_v4 = vadd.f32 %v502_v3, %v500_v1  ;;  %v2796_v1 = vld [vmem:[#allocation7 + $0xf0] sm:$0xff]  }
 0x4ea   :  { %v498_v8 = vpop.permute.xlu1 %497  ;;  %v2800_v3 = vld [vmem:[#allocation7 + $0xb0] sm:$0xff]  }
 0x4eb   :  { %2172 = vtanh.f32 %v2712_v4 }
 0x4f3   :  { %v2171_v5 = vpop.eup %2170 }
 0x4f4   :  { %v507_v9 = vmul.f32 %v2171_v5, %v496_v7  ;;  %v2802_v5 = vld [vmem:[#allocation7 + $0xf8] sm:$0xff]  }
 0x4f5   :  { %v2173_v6 = vpop.eup %2172 }
 0x4f6   :  { %v508_v10 = vmul.f32 %v2173_v6, %v498_v8  ;;  %v2806_v6 = vld [vmem:[#allocation7 + $0xb8] sm:$0xff]  }
 0x4f8   :  { %v512_v12 = vpack.c.bf16 %v508_v10, %v507_v9 }
 0x4fa   :  { %551 = vmatprep.mubr.bf16.mxu1 %v512_v12 }
 0x4fb   :  { %552 = vmatmul.mubr.bf16.vlgmr.msra.gmra.mrb[4].mxu1 %v2072_v11 }
 0x4fc   :  { %1978 = vmatpush3.bf16.msra.mxu1 %v2074_v14  ;;  %1993 = vmatprep.mubr.msk.bf16.mxu1 %vm2418_vm3, %v2417_v15 }
 0x4fd   :  { %1979 = vmatprep.subr.bf16.mxu1 %v2417_v15 }
 0x500   :  { %1980 = vmatpush3.bf16.msra.mxu1 %v2076_v17 }
 0x501   :  { %1981 = vmatprep.subr.bf16.mxu1 %v2417_v15 }
 0x504   :  { %1982 = vmatpush3.bf16.msra.mxu1 %v2078_v36 }
 0x505   :  { %1983 = vmatprep.subr.bf16.mxu1 %v2417_v15 }
 0x5ce   :  { %v1827_v18 = vpop.f32.mrb[4].mxu1 }
 0x5cf   :  { %v1828_v20 = vpop.f32.mrb[5].mxu1 }
 0x5d0   :  { %v1829_v21 = vadd.f32 %v1828_v20, %v1827_v18  ;;  %v1830_v22 = vpop.f32.mrb[6].mxu1 }
 0x5d1   :  { %v1831_v23 = vpop.f32.mrb[7].mxu1 }
 0x5d2   :  { %v554_v24 = vadd.f32 %v1829_v21, %v2640_v19  ;;  %v1832_v25 = vadd.f32 %v1831_v23, %v1830_v22 }
 0x5d4   :  { %v1666_v26 = vmul.f32 -1.442695, %v554_v24  ;;  %v557_v27 = vadd.f32 %v1832_v25, %v2640_v19  ;;  %v2080_v19 = vld [vmem:[#allocation8 + $0x18] sm:$0xff]  }
 0x5d5   :  { %1984 = vmatpush3.bf16.msra.mxu1 %v2080_v19 }
 0x5d6   :  { %2174 = vpow2.f32 %v1666_v26  ;;  %v1667_v28 = vmul.f32 -1.442695, %v557_v27  ;;  %1985 = vmatprep.subr.bf16.mxu1 %v2417_v15 }
 0x5d8   :  { %2176 = vpow2.f32 %v1667_v28 }
 0x5d9   :  { %2178 = vtanh.f32 %v554_v24  ;;  %1986 = vmatpush3.bf16.msra.mxu1 %v2082_v39 }
 0x5da   :  { %1987 = vmatprep.subr.bf16.mxu1 %v2417_v15 }
 0x5dd   :  { %1988 = vmatpush3.bf16.msra.mxu1 %v2084_v46 }
 0x5de   :  { %1989 = vmatprep.subr.bf16.mxu1 %v2417_v15 }
 0x5e0   :  { %v2175_v29 = vpop.eup %2174 }
 0x5e1   :  { %v568_v30 = vadd.f32 1.0, %v2175_v29  ;;  %1990 = vmatpush3.bf16.msra.mxu1 %v2086_v49 }
 0x5e2   :  { %v2177_v31 = vpop.eup %2176  ;;  %1991 = vmatprep.subr.bf16.mxu1 %v2417_v15 }
 0x5e3   :  { %2180 = vrcp.f32 %v568_v30  ;;  %v569_v33 = vadd.f32 1.0, %v2177_v31  ;;  %v2179_v40 = vpop.eup %2178 }
 0x5e4   :  { %2182 = vtanh.f32 %v557_v27 }
 0x5e5   :  { %2184 = vrcp.f32 %v569_v33  ;;  %1992 = vmatpush3.bf16.msra.mxu1 %v2088_v50 }
 0x5e6   :  { %1873 = vmatprep.subr.bf16.mxu1 %v2753_v51 }
 0x5e8   :  { %1994 = vmatmul.mubr.bf16.vlgmr.msra.gmra.mrb[8].mxu1 %v2759_v52 }
 0x5e9   :  { %1874 = vmatpush3.bf16.msra.mxu1 %v2762_v53 }
 0x5ea   :  { %1875 = vmatprep.subr.bf16.mxu1 %v2766_v54 }
 0x5ed   :  { %v2181_v41 = vpop.eup %2180  ;;  %1876 = vmatpush3.bf16.msra.mxu1 %v2770_v55 }
 0x5ee   :  { %v2183_v42 = vpop.eup %2182  ;;  %v2730_v43 = vsel %vm2648_vm2, %v2179_v40, %v2181_v41  ;;  %1877 = vmatprep.subr.bf16.mxu1 %v2772_v56 }
 0x5ef   :  { %v2185_v45 = vpop.eup %2184  ;;  %576 = vrot.lane.b32.xlu0 %v2730_v43, %s2415_s29 }
 0x5f0   :  { %v2737_v47 = vsel %vm2648_vm2, %v2183_v42, %v2185_v45 }
 0x5f1   :  { %578 = vrot.lane.b32.xlu1 %v2737_v47, %s2415_s29  ;;  %1878 = vmatpush3.bf16.msra.mxu1 %v2776_v57 }
 0x5f2   :  { %1879 = vmatprep.subr.bf16.mxu1 %v2778_v58 }
 0x5f3   :  { %580 = vrot.lane.b32.xlu0 %v2730_v43, %s2414_s28 }
 0x5f5   :  { %582 = vrot.lane.b32.xlu1 %v2737_v47, %s2414_s28  ;;  %1880 = vmatpush3.bf16.msra.mxu1 %v2782_v59 }
 0x5f6   :  { %1881 = vmatprep.subr.bf16.mxu1 %v2784_v60 }
 0x5f7   :  { %584 = vrot.lane.b32.xlu0 %v2730_v43, %s2416_s30 }
 0x5f9   :  { %586 = vrot.lane.b32.xlu1 %v2737_v47, %s2416_s30  ;;  %1882 = vmatpush3.bf16.msra.mxu1 %v2788_v61 }
 0x5fa   :  { %1883 = vmatprep.subr.bf16.mxu1 %v2790_v62 }
 0x5fd   :  { %1884 = vmatpush3.bf16.msra.mxu1 %v2794_v63 }
 0x5fe   :  { %1885 = vmatprep.subr.bf16.mxu1 %v2796_v1 }
 0x601   :  { %1886 = vmatpush3.bf16.msra.mxu1 %v2800_v3 }
 0x602   :  { %1887 = vmatprep.subr.bf16.mxu1 %v2802_v5 }
 0x605   :  { %1888 = vmatpush3.bf16.msra.mxu1 %v2806_v6 }
 0x606   :  { %1917 = vmatprep.subr.bf16.mxu1 %v2753_v51 }
 0x661   :  { %v577_v7 = vpop.permute.xlu0 %576 }
 0x662   :  { %v588_v10 = vmul.f32 %v577_v7, %v2709_v2 }
 0x663   :  { %v579_v8 = vpop.permute.xlu1 %578 }
 0x664   :  { %v589_v13 = vmul.f32 %v579_v8, %v2712_v4 }
 0x665   :  { %v581_v9 = vpop.permute.xlu0 %580 }
 0x666   :  { %v590_v11 = vmul.f32 %v581_v9, %v2730_v43 }
 0x667   :  { %v583_v12 = vpop.permute.xlu1 %582 }
 0x668   :  { %v592_v14 = vadd.f32 %v590_v11, %v588_v10  ;;  %v591_v16 = vmul.f32 %v583_v12, %v2737_v47 }
 0x669   :  { %v585_v21 = vpop.permute.xlu0 %584 }
 0x66a   :  { %2186 = vtanh.f32 %v592_v14  ;;  %v593_v17 = vadd.f32 %v591_v16, %v589_v13 }
 0x66b   :  { %v587_v22 = vpop.permute.xlu1 %586 }
 0x66c   :  { %2188 = vtanh.f32 %v593_v17 }
 0x674   :  { %v2187_v18 = vpop.eup %2186 }
 0x675   :  { %v596_v23 = vmul.f32 %v2187_v18, %v585_v21 }
 0x676   :  { %v2189_v20 = vpop.eup %2188 }
 0x677   :  { %v597_v24 = vmul.f32 %v2189_v20, %v587_v22 }
 0x679   :  { %v598_v25 = vpack.c.bf16 %v597_v24, %v596_v23 }
 0x67b   :  { %1974 = vmatmul.mubr.bf16.vlgmr.msra.gmra.mrb[8].mxu0 %v598_v25 }
 0x67c   :  { %1852 = vmatpush3.bf16.msra.mxu0 %v2762_v53  ;;  %1017 = vmatprep.mubr.bf16.mxu0 %v2413_v0  ;;  %v2106_v0 = vld [vmem:[#allocation2 + $0x20] sm:$0xff]  }
 0x67d   :  { %1853 = vmatprep.subr.bf16.mxu0 %v2766_v54 }
 0x680   :  { %1854 = vmatpush3.bf16.msra.mxu0 %v2770_v55 }
 0x681   :  { %1855 = vmatprep.subr.bf16.mxu0 %v2772_v56 }
 0x684   :  { %1856 = vmatpush3.bf16.msra.mxu0 %v2776_v57 }
 0x685   :  { %1857 = vmatprep.subr.bf16.mxu0 %v2778_v58 }
 0x688   :  { %1858 = vmatpush3.bf16.msra.mxu0 %v2782_v59 }
 0x689   :  { %1859 = vmatprep.subr.bf16.mxu0 %v2784_v60 }
 0x68c   :  { %1860 = vmatpush3.bf16.msra.mxu0 %v2788_v61 }
 0x68d   :  { %1861 = vmatprep.subr.bf16.mxu0 %v2790_v62 }
 0x690   :  { %1862 = vmatpush3.bf16.msra.mxu0 %v2794_v63 }
 0x691   :  { %1863 = vmatprep.subr.bf16.mxu0 %v2796_v1 }
 0x694   :  { %1864 = vmatpush3.bf16.msra.mxu0 %v2800_v3 }
 0x695   :  { %1865 = vmatprep.subr.bf16.mxu0 %v2802_v5 }
 0x698   :  { %1866 = vmatpush3.bf16.msra.mxu0 %v2806_v6 }
 0x699   :  { %1895 = vmatprep.subr.bf16.mxu0 %v2753_v51 }
 0x69b   :  { %1018 = vmatmul.mubr.bf16.vlgmr.msra.gmra.mrb[12].mxu0 %v2106_v0 }
 0x69c   :  { %1896 = vmatpush3.bf16.msra.mxu0 %v2762_v53 }
 0x69d   :  { %1897 = vmatprep.subr.bf16.mxu0 %v2766_v54 }
 0x6a0   :  { %1898 = vmatpush3.bf16.msra.mxu0 %v2770_v55 }
 0x6a1   :  { %1899 = vmatprep.subr.bf16.mxu0 %v2772_v56 }
 0x6a4   :  { %1900 = vmatpush3.bf16.msra.mxu0 %v2776_v57 }
 0x6a5   :  { %1901 = vmatprep.subr.bf16.mxu0 %v2778_v58 }
 0x6a8   :  { %1902 = vmatpush3.bf16.msra.mxu0 %v2782_v59 }
 0x6a9   :  { %1903 = vmatprep.subr.bf16.mxu0 %v2784_v60 }
 0x6ac   :  { %1904 = vmatpush3.bf16.msra.mxu0 %v2788_v61 }
 0x6ad   :  { %1905 = vmatprep.subr.bf16.mxu0 %v2790_v62 }
 0x6b0   :  { %1906 = vmatpush3.bf16.msra.mxu0 %v2794_v63 }
 0x6b1   :  { %1907 = vmatprep.subr.bf16.mxu0 %v2796_v1 }
 0x6b4   :  { %1908 = vmatpush3.bf16.msra.mxu0 %v2800_v3 }
 0x6b5   :  { %1909 = vmatprep.subr.bf16.mxu0 %v2802_v5 }
 0x6b8   :  { %1910 = vmatpush3.bf16.msra.mxu0 %v2806_v6 }
 0x6b9   :  { %1997 = vmatprep.subr.bf16.mxu0 %v2417_v15 }
 0x6bb   :  { %v808_v2 = vpop.f32.mrb[8].mxu1 }
 0x6bc   :  { %v1995_v4 = vpop.f32.mrb[9].mxu1 }
 0x6bd   :  { %v811_v26 = vpop.f32.mrb[10].mxu1  ;;  %v2107_v4 = vld [vmem:[#allocation2 + $0x28] sm:$0xff]  }
 0x6be   :  { %v1996_v27 = vpop.f32.mrb[11].mxu1 }
 0x74e   :  { %v697_v28 = vpop.f32.mrb[8].mxu0 }
 0x74f   :  { %v2847_v29 = vadd.f32 %v808_v2, %v697_v28  ;;  %v1975_v30 = vpop.f32.mrb[9].mxu0 }
 0x750   :  { %v700_v31 = vpop.f32.mrb[10].mxu0 }
 0x751   :  { %v2849_v32 = vadd.f32 %v811_v26, %v700_v31  ;;  %v1976_v33 = vpop.f32.mrb[11].mxu0 }
 0x76e   :  { %v1867_v36 = vpop.f32.mrb[12].mxu0 }
 0x76f   :  { %v1868_v19 = vpop.f32.mrb[13].mxu0 }
 0x770   :  { %v1869_v38 = vadd.f32 %v1868_v19, %v1867_v36  ;;  %v1870_v39 = vpop.f32.mrb[14].mxu0 }
 0x771   :  { %v1871_v40 = vpop.f32.mrb[15].mxu0 }
 0x772   :  { %v1020_v41 = vadd.f32 %v1869_v38, %v2854_v37  ;;  %v1872_v42 = vadd.f32 %v1871_v40, %v1870_v39 }
 0x774   :  { %v1705_v43 = vmul.f32 -1.442695, %v1020_v41  ;;  %v1023_v44 = vadd.f32 %v1872_v42, %v2854_v37 }
 0x776   :  { %2190 = vpow2.f32 %v1705_v43  ;;  %v1706_v45 = vmul.f32 -1.442695, %v1023_v44 }
 0x778   :  { %2192 = vpow2.f32 %v1706_v45 }
 0x779   :  { %2194 = vtanh.f32 %v1020_v41 }
 0x780   :  { %v2191_v46 = vpop.eup %2190 }
 0x781   :  { %v1034_v47 = vadd.f32 1.0, %v2191_v46 }
 0x782   :  { %v2193_v48 = vpop.eup %2192 }
 0x783   :  { %2196 = vrcp.f32 %v1034_v47  ;;  %v1035_v49 = vadd.f32 1.0, %v2193_v48  ;;  %v2195_v50 = vpop.eup %2194 }
 0x784   :  { %2198 = vtanh.f32 %v1023_v44 }
 0x785   :  { %2200 = vrcp.f32 %v1035_v49 }
 0x78d   :  { %v2197_v51 = vpop.eup %2196 }
 0x78e   :  { %v2199_v7 = vpop.eup %2198  ;;  %v1040_v8 = vsel %vm2860_vm6, %v2195_v50, %v2197_v51 }
 0x78f   :  { %v2201_v9 = vpop.eup %2200  ;;  %1042 = vrot.lane.b32.xlu0 %v1040_v8, %s2419_s3 }
 0x790   :  { %v1041_v10 = vsel %vm2860_vm6, %v2199_v7, %v2201_v9  ;;  %v2108_v7 = vld [vmem:[#allocation2 + $0x30] sm:$0xff]  }
 0x791   :  { %1044 = vrot.lane.b32.xlu1 %v1041_v10, %s2419_s3 }
 0x793   :  { %1046 = vrot.lane.b32.xlu0 %v1040_v8, %s2416_s30 }
 0x795   :  { %1048 = vrot.lane.b32.xlu1 %v1041_v10, %s2416_s30 }
 0x797   :  { %1050 = vrot.lane.b32.xlu0 %v1040_v8, %s2420_s1 }
 0x799   :  { %1052 = vrot.lane.b32.xlu1 %v1041_v10, %s2420_s1 }
 0x801   :  { %v1043_v34 = vpop.permute.xlu0 %1042 }
 0x802   :  { %v1054_v13 = vmul.f32 0.0, %v1043_v34 }
 0x803   :  { %v1045_v11 = vpop.permute.xlu1 %1044 }
 0x804   :  { %v1055_v17 = vmul.f32 0.0, %v1045_v11 }
 0x805   :  { %v1047_v12 = vpop.permute.xlu0 %1046 }
 0x806   :  { %v1056_v14 = vmul.f32 %v1047_v12, %v1040_v8 }
 0x807   :  { %v1049_v16 = vpop.permute.xlu1 %1048 }
 0x808   :  { %v2874_v18 = vadd.f32 %v1056_v14, %v1054_v13  ;;  %v1057_v20 = vmul.f32 %v1049_v16, %v1041_v10 }
 0x809   :  { %v1051_v24 = vpop.permute.xlu0 %1050 }
 0x80a   :  { %2202 = vtanh.f32 %v2874_v18  ;;  %v2877_v21 = vadd.f32 %v1057_v20, %v1055_v17 }
 0x80b   :  { %v1053_v25 = vpop.permute.xlu1 %1052 }
 0x80c   :  { %2204 = vtanh.f32 %v2877_v21 }
 0x814   :  { %v2203_v22 = vpop.eup %2202 }
 0x815   :  { %v1062_v0 = vmul.f32 %v2203_v22, %v1051_v24 }
 0x816   :  { %v2205_v23 = vpop.eup %2204 }
 0x817   :  { %v1063_v2 = vmul.f32 %v2205_v23, %v1053_v25 }
 0x819   :  { %v1067_v26 = vpack.c.bf16 %v1063_v2, %v1062_v0 }
 0x81b   :  { %1106 = vmatprep.mubr.bf16.mxu1 %v1067_v26 }
 0x81c   :  { %1107 = vmatmul.mubr.bf16.vlgmr.msra.gmra.mrb[12].mxu1 %v2107_v4 }
 0x81d   :  { %1918 = vmatpush3.bf16.msra.mxu1 %v2762_v53 }
 0x81e   :  { %1919 = vmatprep.subr.bf16.mxu1 %v2766_v54 }
 0x821   :  { %1920 = vmatpush3.bf16.msra.mxu1 %v2770_v55 }
 0x822   :  { %1921 = vmatprep.subr.bf16.mxu1 %v2772_v56 }
 0x825   :  { %1922 = vmatpush3.bf16.msra.mxu1 %v2776_v57 }
 0x826   :  { %1923 = vmatprep.subr.bf16.mxu1 %v2778_v58 }
 0x829   :  { %1924 = vmatpush3.bf16.msra.mxu1 %v2782_v59 }
 0x82a   :  { %1925 = vmatprep.subr.bf16.mxu1 %v2784_v60 }
 0x82d   :  { %1926 = vmatpush3.bf16.msra.mxu1 %v2788_v61 }
 0x82e   :  { %1927 = vmatprep.subr.bf16.mxu1 %v2790_v62 }
 0x831   :  { %1928 = vmatpush3.bf16.msra.mxu1 %v2794_v63 }
 0x832   :  { %1929 = vmatprep.subr.bf16.mxu1 %v2796_v1 }
 0x835   :  { %1930 = vmatpush3.bf16.msra.mxu1 %v2800_v3 }
 0x836   :  { %1931 = vmatprep.subr.bf16.mxu1 %v2802_v5 }
 0x839   :  { %1932 = vmatpush3.bf16.msra.mxu1 %v2806_v6 }
 0x83a   :  { %2017 = vmatprep.subr.bf16.mxu1 %v2417_v15 }
 0x8ef   :  { %v1889_v53 = vpop.f32.mrb[12].mxu1 }
 0x8f0   :  { %v1890_v54 = vpop.f32.mrb[13].mxu1 }
 0x8f1   :  { %v1891_v55 = vadd.f32 %v1890_v54, %v1889_v53  ;;  %v1892_v56 = vpop.f32.mrb[14].mxu1 }
 0x8f2   :  { %v1893_v57 = vpop.f32.mrb[15].mxu1 }
 0x8f3   :  { %v1109_v58 = vadd.f32 %v1891_v55, %v2854_v37  ;;  %v1894_v59 = vadd.f32 %v1893_v57, %v1892_v56 }
 0x8f5   :  { %v1708_v60 = vmul.f32 -1.442695, %v1109_v58  ;;  %v1112_v61 = vadd.f32 %v1894_v59, %v2854_v37 }
 0x8f7   :  { %2206 = vpow2.f32 %v1708_v60  ;;  %v1709_v62 = vmul.f32 -1.442695, %v1112_v61 }
 0x8f9   :  { %2208 = vpow2.f32 %v1709_v62 }
 0x8fa   :  { %2210 = vtanh.f32 %v1109_v58 }
 0x901   :  { %v2207_v63 = vpop.eup %2206 }
 0x902   :  { %v1123_v1 = vadd.f32 1.0, %v2207_v63 }
 0x903   :  { %v2209_v3 = vpop.eup %2208 }
 0x904   :  { %2212 = vrcp.f32 %v1123_v1  ;;  %v1124_v5 = vadd.f32 1.0, %v2209_v3  ;;  %v2211_v6 = vpop.eup %2210 }
 0x905   :  { %2214 = vtanh.f32 %v1112_v61 }
 0x906   :  { %2216 = vrcp.f32 %v1124_v5 }
 0x90e   :  { %v2213_v27 = vpop.eup %2212 }
 0x90f   :  { %v2215_v28 = vpop.eup %2214  ;;  %v1129_v30 = vsel %vm2860_vm6, %v2211_v6, %v2213_v27 }
 0x910   :  { %v2217_v31 = vpop.eup %2216  ;;  %1131 = vrot.lane.b32.xlu0 %v1129_v30, %s2419_s3 }
 0x911   :  { %v1130_v33 = vsel %vm2860_vm6, %v2215_v28, %v2217_v31  ;;  %v2109_v28 = vld [vmem:[#allocation2 + $0x38] sm:$0xff]   ;;  %v2110_v31 = vld [vmem:[#allocation8 + $0x40] sm:$0xff]  }
 0x912   :  { %1133 = vrot.lane.b32.xlu1 %v1130_v33, %s2419_s3 }
 0x914   :  { %1135 = vrot.lane.b32.xlu0 %v1129_v30, %s2416_s30 }
 0x916   :  { %1137 = vrot.lane.b32.xlu1 %v1130_v33, %s2416_s30 }
 0x918   :  { %1139 = vrot.lane.b32.xlu0 %v1129_v30, %s2420_s1 }
 0x91a   :  { %1141 = vrot.lane.b32.xlu1 %v1130_v33, %s2420_s1 }
 0x982   :  { %v1132_v36 = vpop.permute.xlu0 %1131 }
 0x983   :  { %v1143_v39 = vmul.f32 %v1132_v36, %v2874_v18  ;;  %v2112_v36 = vld [vmem:[#allocation8 + $0x48] sm:$0xff]  }
 0x984   :  { %v1134_v19 = vpop.permute.xlu1 %1133 }
 0x985   :  { %v1144_v42 = vmul.f32 %v1134_v19, %v2877_v21  ;;  %v2113_v19 = vld [vmem:[#allocation10 + $0x48] sm:$0xff]  }
 0x986   :  { %v1136_v38 = vpop.permute.xlu0 %1135 }
 0x987   :  { %v1145_v40 = vmul.f32 %v1136_v38, %v1129_v30  ;;  %v2114_v38 = vld [vmem:[#allocation8 + $0x50] sm:$0xff]  }
 0x988   :  { %v1138_v41 = vpop.permute.xlu1 %1137 }
 0x989   :  { %v1147_v43 = vadd.f32 %v1145_v40, %v1143_v39  ;;  %v1146_v44 = vmul.f32 %v1138_v41, %v1130_v33  ;;  %v2111_v33 = vld [vmem:[#allocation10 + $0x40] sm:$0xff]  }
 0x98a   :  { %v1140_v48 = vpop.permute.xlu0 %1139 }
 0x98b   :  { %2218 = vtanh.f32 %v1147_v43  ;;  %v1148_v45 = vadd.f32 %v1146_v44, %v1144_v42 }
 0x98c   :  { %v1142_v49 = vpop.permute.xlu1 %1141 }
 0x98d   :  { %2220 = vtanh.f32 %v1148_v45 }
 0x995   :  { %v2219_v46 = vpop.eup %2218 }
 0x996   :  { %v1151_v50 = vmul.f32 %v2219_v46, %v1140_v48 }
 0x997   :  { %v2221_v47 = vpop.eup %2220 }
 0x998   :  { %v1152_v51 = vmul.f32 %v2221_v47, %v1142_v49 }
 0x99a   :  { %v1156_v8 = vpack.c.bf16 %v1152_v51, %v1151_v50 }
 0x99c   :  { %1195 = vmatprep.mubr.bf16.mxu0 %v1156_v8  ;;  %v2115_v8 = vld [vmem:[#allocation10 + $0x50] sm:$0xff]  }
 0x99d   :  { %1196 = vmatmul.mubr.bf16.vlgmr.msra.gmra.mrb[16].mxu0 %v2108_v7 }
 0x99e   :  { %2013 = vmatprep.mubr.msk.bf16.mxu0 %vm2418_vm3, %v2417_v15  ;;  %1998 = vmatpush3.bf16.msra.mxu0 %v2111_v33 }
 0x99f   :  { %1999 = vmatprep.subr.bf16.mxu0 %v2417_v15 }
 0x9a2   :  { %2000 = vmatpush3.bf16.msra.mxu0 %v2113_v19 }
 0x9a3   :  { %2001 = vmatprep.subr.bf16.mxu0 %v2417_v15 }
 0x9a6   :  { %2002 = vmatpush3.bf16.msra.mxu0 %v2115_v8 }
 0x9a7   :  { %2003 = vmatprep.subr.bf16.mxu0 %v2417_v15 }
 0xa70   :  { %v1911_v9 = vpop.f32.mrb[16].mxu0 }
 0xa71   :  { %v1912_v10 = vpop.f32.mrb[17].mxu0 }
 0xa72   :  { %v1913_v34 = vadd.f32 %v1912_v10, %v1911_v9  ;;  %v1914_v11 = vpop.f32.mrb[18].mxu0  ;;  %v2116_v9 = vld [vmem:[#allocation8 + $0x58] sm:$0xff]  }
 0xa73   :  { %v1915_v12 = vpop.f32.mrb[19].mxu0  ;;  %v2117_v10 = vld [vmem:[#allocation10 + $0x58] sm:$0xff]  }
 0xa74   :  { %v1198_v13 = vadd.f32 %v1913_v34, %v2854_v37  ;;  %v1916_v14 = vadd.f32 %v1915_v12, %v1914_v11  ;;  %2004 = vmatpush3.bf16.msra.mxu0 %v2117_v10  ;;  %v2119_v34 = vld [vmem:[#allocation10 + $0x60] sm:$0xff]   ;;  %v2120_v12 = vld [vmem:[#allocation8 + $0x68] sm:$0xff]  }
 0xa75   :  { %2005 = vmatprep.subr.bf16.mxu0 %v2417_v15 }
 0xa76   :  { %v1711_v16 = vmul.f32 -1.442695, %v1198_v13  ;;  %v1201_v17 = vadd.f32 %v1916_v14, %v2854_v37 }
 0xa78   :  { %2222 = vpow2.f32 %v1711_v16  ;;  %v1712_v18 = vmul.f32 -1.442695, %v1201_v17  ;;  %2006 = vmatpush3.bf16.msra.mxu0 %v2119_v34 }
 0xa79   :  { %2007 = vmatprep.subr.bf16.mxu0 %v2417_v15 }
 0xa7a   :  { %2224 = vpow2.f32 %v1712_v18  ;;  %v2121_v18 = vld [vmem:[#allocation10 + $0x68] sm:$0xff]  }
 0xa7b   :  { %2226 = vtanh.f32 %v1198_v13 }
 0xa7c   :  { %2008 = vmatpush3.bf16.msra.mxu0 %v2121_v18 }
 0xa7d   :  { %2009 = vmatprep.subr.bf16.mxu0 %v2417_v15 }
 0xa82   :  { %v2223_v20 = vpop.eup %2222 }
 0xa83   :  { %v1212_v21 = vadd.f32 1.0, %v2223_v20 }
 0xa84   :  { %v2225_v22 = vpop.eup %2224 }
 0xa85   :  { %2228 = vrcp.f32 %v1212_v21  ;;  %v1213_v23 = vadd.f32 1.0, %v2225_v22  ;;  %v2227_v24 = vpop.eup %2226  ;;  %v2122_v21 = vld [vmem:[#allocation8 + $0x70] sm:$0xff]  }
 0xa86   :  { %2230 = vtanh.f32 %v1201_v17  ;;  %v2123_v22 = vld [vmem:[#allocation10 + $0x70] sm:$0xff]  }
 0xa87   :  { %2232 = vrcp.f32 %v1213_v23  ;;  %v2124_v23 = vld [vmem:[#allocation8 + $0x78] sm:$0xff]   ;;  %2010 = vmatpush3.bf16.msra.mxu0 %v2123_v22 }
 0xa88   :  { %2011 = vmatprep.subr.bf16.mxu0 %v2417_v15 }
 0xa8b   :  { %2012 = vmatpush3.bf16.msra.mxu0 %v2125_v35 }
 0xa8f   :  { %v2229_v25 = vpop.eup %2228 }
 0xa90   :  { %v2231_v0 = vpop.eup %2230  ;;  %v1218_v2 = vsel %vm2860_vm6, %v2227_v24, %v2229_v25 }
 0xa91   :  { %v2233_v4 = vpop.eup %2232  ;;  %1220 = vrot.lane.b32.xlu0 %v1218_v2, %s2419_s3 }
 0xa92   :  { %v1219_v26 = vsel %vm2860_vm6, %v2231_v0, %v2233_v4 }
 0xa93   :  { %1222 = vrot.lane.b32.xlu1 %v1219_v26, %s2419_s3 }
 0xa95   :  { %1224 = vrot.lane.b32.xlu0 %v1218_v2, %s2416_s30 }
 0xa97   :  { %1226 = vrot.lane.b32.xlu1 %v1219_v26, %s2416_s30 }
 0xa99   :  { %1228 = vrot.lane.b32.xlu0 %v1218_v2, %s2420_s1 }
 0xa9b   :  { %1230 = vrot.lane.b32.xlu1 %v1219_v26, %s2420_s1 }
 0xb03   :  { %v1221_v53 = vpop.permute.xlu0 %1220 }
 0xb04   :  { %v1232_v56 = vmul.f32 %v1221_v53, %v1147_v43 }
 0xb05   :  { %v1223_v54 = vpop.permute.xlu1 %1222 }
 0xb06   :  { %v1233_v59 = vmul.f32 %v1223_v54, %v1148_v45 }
 0xb07   :  { %v1225_v55 = vpop.permute.xlu0 %1224 }
 0xb08   :  { %v1234_v57 = vmul.f32 %v1225_v55, %v1218_v2 }
 0xb09   :  { %v1227_v58 = vpop.permute.xlu1 %1226 }
 0xb0a   :  { %v2924_v60 = vadd.f32 %v1234_v57, %v1232_v56  ;;  %v1235_v61 = vmul.f32 %v1227_v58, %v1219_v26 }
 0xb0b   :  { %v1229_v3 = vpop.permute.xlu0 %1228 }
 0xb0c   :  { %2234 = vtanh.f32 %v2924_v60  ;;  %v2927_v62 = vadd.f32 %v1235_v61, %v1233_v59 }
 0xb0d   :  { %v1231_v5 = vpop.permute.xlu1 %1230 }
 0xb0e   :  { %2236 = vtanh.f32 %v2927_v62 }
 0xb16   :  { %v2235_v63 = vpop.eup %2234 }
 0xb17   :  { %v1240_v6 = vmul.f32 %v2235_v63, %v1229_v3 }
 0xb18   :  { %v2237_v1 = vpop.eup %2236 }
 0xb19   :  { %v1241_v27 = vmul.f32 %v2237_v1, %v1231_v5 }
 0xb1b   :  { %v1245_v30 = vpack.c.bf16 %v1241_v27, %v1240_v6 }
 0xb1d   :  { %1284 = vmatprep.mubr.bf16.mxu1 %v1245_v30 }
 0xb1e   :  { %1285 = vmatmul.mubr.bf16.vlgmr.msra.gmra.mrb[16].mxu1 %v2109_v28 }
 0xb1f   :  { %2033 = vmatprep.mubr.msk.bf16.mxu1 %vm2418_vm3, %v2417_v15  ;;  %2018 = vmatpush3.bf16.msra.mxu1 %v2110_v31  ;;  %v1733_v31 = vld [vmem:[%s2996_s6 + $0x1] ss:$0 sm:$0xff] }
 0xb20   :  { %2019 = vmatprep.subr.bf16.mxu1 %v2417_v15 }
 0xb23   :  { %2020 = vmatpush3.bf16.msra.mxu1 %v2112_v36 }
 0xb24   :  { %2021 = vmatprep.subr.bf16.mxu1 %v2417_v15 }
 0xb27   :  { %2022 = vmatpush3.bf16.msra.mxu1 %v2114_v38 }
 0xb28   :  { %2023 = vmatprep.subr.bf16.mxu1 %v2417_v15 }
 0xb2b   :  { %2024 = vmatpush3.bf16.msra.mxu1 %v2116_v9 }
 0xb2c   :  { %2025 = vmatprep.subr.bf16.mxu1 %v2417_v15 }
 0xbf1   :  { %v1933_v39 = vpop.f32.mrb[16].mxu1 }
 0xbf2   :  { %v1934_v40 = vpop.f32.mrb[17].mxu1 }
 0xbf3   :  { %v1935_v41 = vadd.f32 %v1934_v40, %v1933_v39  ;;  %v1936_v42 = vpop.f32.mrb[18].mxu1 }
 0xbf4   :  { %v1937_v43 = vpop.f32.mrb[19].mxu1 }
 0xbf5   :  { %v1287_v44 = vadd.f32 %v1935_v41, %v2854_v37  ;;  %v1938_v45 = vadd.f32 %v1937_v43, %v1936_v42 }
 0xbf7   :  { %v1714_v46 = vmul.f32 -1.442695, %v1287_v44  ;;  %v1290_v47 = vadd.f32 %v1938_v45, %v2854_v37  ;;  %v2118_v37 = vld [vmem:[#allocation8 + $0x60] sm:$0xff]  }
 0xbf8   :  { %2026 = vmatpush3.bf16.msra.mxu1 %v2118_v37 }
 0xbf9   :  { %2238 = vpow2.f32 %v1714_v46  ;;  %v1715_v48 = vmul.f32 -1.442695, %v1290_v47  ;;  %2027 = vmatprep.subr.bf16.mxu1 %v2417_v15 }
 0xbfb   :  { %2240 = vpow2.f32 %v1715_v48 }
 0xbfc   :  { %2242 = vtanh.f32 %v1287_v44  ;;  %2028 = vmatpush3.bf16.msra.mxu1 %v2120_v12 }
 0xbfd   :  { %2029 = vmatprep.subr.bf16.mxu1 %v2417_v15 }
 0xc00   :  { %2030 = vmatpush3.bf16.msra.mxu1 %v2122_v21 }
 0xc01   :  { %2031 = vmatprep.subr.bf16.mxu1 %v2417_v15 }
 0xc03   :  { %v2239_v49 = vpop.eup %2238 }
 0xc04   :  { %v1301_v50 = vadd.f32 1.0, %v2239_v49  ;;  %2032 = vmatpush3.bf16.msra.mxu1 %v2124_v23 }
 0xc05   :  { %v2241_v51 = vpop.eup %2240 }
 0xc06   :  { %2244 = vrcp.f32 %v1301_v50  ;;  %v1302_v7 = vadd.f32 1.0, %v2241_v51  ;;  %v2243_v11 = vpop.eup %2242 }
 0xc07   :  { %2246 = vtanh.f32 %v1290_v47  ;;  %2034 = vmatmul.mubr.bf16.vlgmr.msra.gmra.mrb[20].mxu1 %v2759_v52 }
 0xc08   :  { %2248 = vrcp.f32 %v1302_v7 }
 0xc10   :  { %v2245_v13 = vpop.eup %2244 }
 0xc11   :  { %v2247_v14 = vpop.eup %2246  ;;  %v1307_v16 = vsel %vm2860_vm6, %v2243_v11, %v2245_v13 }
 0xc12   :  { %v2249_v17 = vpop.eup %2248  ;;  %1309 = vrot.lane.b32.xlu0 %v1307_v16, %s2419_s3 }
 0xc13   :  { %v1308_v20 = vsel %vm2860_vm6, %v2247_v14, %v2249_v17 }
 0xc14   :  { %1311 = vrot.lane.b32.xlu1 %v1308_v20, %s2419_s3 }
 0xc16   :  { %1313 = vrot.lane.b32.xlu0 %v1307_v16, %s2416_s30 }
 0xc18   :  { %1315 = vrot.lane.b32.xlu1 %v1308_v20, %s2416_s30 }
 0xc1a   :  { %1317 = vrot.lane.b32.xlu0 %v1307_v16, %s2420_s1 }
 0xc1c   :  { %1319 = vrot.lane.b32.xlu1 %v1308_v20, %s2420_s1 }
 0xc84   :  { %v1310_v24 = vpop.permute.xlu0 %1309 }
 0xc85   :  { %v1321_v2 = vmul.f32 %v1310_v24, %v2924_v60 }
 0xc86   :  { %v1312_v25 = vpop.permute.xlu1 %1311 }
 0xc87   :  { %v1322_v53 = vmul.f32 %v1312_v25, %v2927_v62  ;;  %v1685_v62 = vld [vmem:[%s2996_s6] ss:$0 sm:$0xff] }
 0xc88   :  { %v1314_v0 = vpop.permute.xlu0 %1313  ;;  %v822_v6 = vadd.f32 %v1685_v62, %v2847_v29  ;;  %v823_v27 = vadd.f32 %v1685_v62, %v2849_v32 }
 0xc89   :  { %v1323_v4 = vmul.f32 %v1314_v0, %v1307_v16 }
 0xc8a   :  { %v1316_v26 = vpop.permute.xlu1 %1315  ;;  %v826_v28 = vmul.f32 0.70710677, %v822_v6  ;;  %v827_v33 = vmul.f32 0.70710677, %v823_v27  ;;  %v824_v47 = vmul.f32 0.5, %v822_v6  ;;  %v825_v7 = vmul.f32 0.5, %v823_v27 }
 0xc8b   :  { %v1325_v54 = vadd.f32 %v1323_v4, %v1321_v2  ;;  %v1324_v55 = vmul.f32 %v1316_v26, %v1308_v20 }
 0xc8c   :  { %v1318_v58 = vpop.permute.xlu0 %1317 }
 0xc8d   :  { %2250 = vtanh.f32 %v1325_v54  ;;  %v1326_v15 = vadd.f32 %v1324_v55, %v1322_v53 }
 0xc8e   :  { %v1320_v59 = vpop.permute.xlu1 %1319 }
 0xc8f   :  { %2252 = vtanh.f32 %v1326_v15 }
 0xc90   :  { %2254 = verf.f32 %v826_v28 }
 0xc91   :  { %2256 = verf.f32 %v827_v33 }
 0xc97   :  { %v2251_v56 = vpop.eup %2250 }
 0xc98   :  { %v1329_v61 = vmul.f32 %v2251_v56, %v1318_v58  ;;  %v1734_v56 = vld [vmem:[%s2997_s7] ss:$0 sm:$0xff] }
 0xc99   :  { %v2253_v57 = vpop.eup %2252 }
 0xc9a   :  { %v1330_v52 = vmul.f32 %v2253_v57, %v1320_v59  ;;  %v2255_v32 = vpop.eup %2254 }
 0xc9b   :  { %v2257_v44 = vpop.eup %2256  ;;  %v830_v45 = vadd.f32 1.0, %v2255_v32 }
 0xc9c   :  { %v1331_v63 = vpack.c.bf16 %v1330_v52, %v1329_v61  ;;  %v831_v48 = vadd.f32 1.0, %v2257_v44  ;;  %v1735_v52 = vld [vmem:[%s2998_s8] ss:$0 sm:$0xff] }
 0xc9d   :  { %v832_v10 = vmul.f32 %v830_v45, %v824_v47 }
 0xc9e   :  { %2014 = vmatmul.mubr.bf16.vlgmr.msra.gmra.mrb[20].mxu0 %v1331_v63  ;;  %v833_v11 = vmul.f32 %v831_v48, %v825_v7 }
 0xcda   :  { %v1537_v1 = vpop.f32.mrb[20].mxu1 }
 0xcdb   :  { %v2035_v3 = vpop.f32.mrb[21].mxu1 }
 0xcdc   :  { %v1540_v60 = vpop.f32.mrb[22].mxu1 }
 0xcdd   :  { %v2036_v5 = vpop.f32.mrb[23].mxu1 }
 0xd71   :  { %v1431_v30 = vpop.f32.mrb[20].mxu0 }
 0xd72   :  { %v1538_v36 = vadd.f32 %v1537_v1, %v1431_v30  ;;  %v2015_v19 = vpop.f32.mrb[21].mxu0 }
 0xd73   :  { %v1434_v38 = vpop.f32.mrb[22].mxu0 }
 0xd74   :  { %v1552_v39 = vadd.f32 %v1733_v31, %v1538_v36  ;;  %v1541_v40 = vadd.f32 %v1540_v60, %v1434_v38  ;;  %v2016_v41 = vpop.f32.mrb[23].mxu0 }
 0xd76   :  { %v1556_v42 = vmul.f32 0.70710677, %v1552_v39  ;;  %v1553_v43 = vadd.f32 %v1733_v31, %v1541_v40  ;;  %v1554_v49 = vmul.f32 0.5, %v1552_v39 }
 0xd78   :  { %2258 = verf.f32 %v1556_v42  ;;  %v1557_v29 = vmul.f32 0.70710677, %v1553_v43  ;;  %v1555_v8 = vmul.f32 0.5, %v1553_v43 }
 0xd7a   :  { %2260 = verf.f32 %v1557_v29 }
 0xd82   :  { %v2259_v46 = vpop.eup %2258 }
 0xd83   :  { %v1560_v50 = vadd.f32 1.0, %v2259_v46 }
 0xd84   :  { %v2261_v51 = vpop.eup %2260 }
 0xd85   :  { %v1561_v9 = vadd.f32 1.0, %v2261_v51  ;;  %v1562_v37 = vmul.f32 %v1560_v50, %v1554_v49 }
 0xd87   :  { %v1564_v34 = vadd.f32 %v1562_v37, %v832_v10  ;;  %v1563_v12 = vmul.f32 %v1561_v9, %v1555_v8 }
 0xd89   :  { %1566 = vadd.xlane.f32.xlu0 %v1564_v34  ;;  %v1565_v13 = vadd.f32 %v1563_v12, %v833_v11  ;;  %v1572_v14 = vmul.f32 %v1564_v34, %v1564_v34 }
 0xd8b   :  { %1568 = vadd.xlane.f32.xlu1 %v1565_v13  ;;  %v1573_v16 = vmul.f32 %v1565_v13, %v1565_v13 }
 0xd8d   :  { %1574 = vadd.xlane.f32.xlu0 %v1572_v14 }
 0xd91   :  { %1576 = vadd.xlane.f32.xlu0 %v1573_v16 }
 0xe16   :  { %v1567_v17 = vpop.xlane.xlu0 %1566 }
 0xe17   :  { %v1570_v18 = vmul.f32 0.03125, %v1567_v17 }
 0xe18   :  { %v1569_v20 = vpop.xlane.xlu1 %1568 }
 0xe19   :  { %v1580_v22 = vmul.f32 %v1570_v18, %v1570_v18  ;;  %v1571_v23 = vmul.f32 0.03125, %v1569_v20  ;;  %v1584_v54 = vsub.f32 %v1564_v34, %v1570_v18 }
 0xe1a   :  { %v1575_v21 = vpop.xlane.xlu0 %1574 }
 0xe1b   :  { %v1578_v35 = vmul.f32 0.03125, %v1575_v21  ;;  %v1581_v0 = vmul.f32 %v1571_v23, %v1571_v23  ;;  %v1585_v57 = vsub.f32 %v1565_v13, %v1571_v23 }
 0xe1d   :  { %v1582_v24 = vsub.f32 %v1578_v35, %v1580_v22 }
 0xe1e   :  { %v1577_v25 = vpop.xlane.xlu0 %1576 }
 0xe1f   :  { %v1586_v2 = vadd.f32 1e-05, %v1582_v24  ;;  %v1579_v4 = vmul.f32 0.03125, %v1577_v25 }
 0xe21   :  { %2262 = vrsqrt.f32 %v1586_v2  ;;  %v1583_v26 = vsub.f32 %v1579_v4, %v1581_v0 }
 0xe23   :  { %v1587_v53 = vadd.f32 1e-05, %v1583_v26 }
 0xe25   :  { %2264 = vrsqrt.f32 %v1587_v53 }
 0xe2b   :  { %v2263_v55 = vpop.eup %2262 }
 0xe2c   :  { %v1590_v15 = vmul.f32 %v2263_v55, %v1584_v54 }
 0xe2e   :  { %v1599_v61 = vmul.f32 %v1734_v56, %v1590_v15 }
 0xe2f   :  { %v2265_v58 = vpop.eup %2264 }
 0xe30   :  { %v1591_v59 = vmul.f32 %v2265_v58, %v1585_v57  ;;  %v1608_v1 = vadd.f32 %v1735_v52, %v1599_v61 }
 0xe32   :  { %v1600_v63 = vmul.f32 %v1734_v56, %v1591_v59 }
 0xe34   :  { %v1609_v3 = vadd.f32 %v1735_v52, %v1600_v63 }
 0xe36   :  { %v1743_v60 = vpack.c.bf16 %v1609_v3, %v1608_v1 }
 0xe38   :  { %1744 = vst [vmem:[#allocation11] sm:$0xff] %v1743_v60  }
 0xe39   :  { %2387 = shalt.err (!%p2384_p2)
}
 0xe3a   :  { %s2388_s26 = scalar_lea.hbm %s2999_s9, 128 }
 0xe3b   :  { %p2389_p3 = scmp.ne.s32.totalorder %s2999_s9, %s2388_s26  ;;  %p2392_p4 = scmp.lt.u32.totalorder %s2388_s26, %s2999_s9 }
 0xe3d   :  { %p2394_p5 = pnand %p2392_p4, %p2389_p3 }
 0xe3f   :  { %2397 = shalt.err (!%p2394_p5)
}
 0xe40   :  { %1631 = dma.vmem_to_hbm [thread:$0]  %s1626_s23, 128, %s2999_s9, [#allocation4], %s2408_s21, %s2408_s21, %s2409_s22  }
 0xe41   :  { %2404 = dma.done.wait [#allocation4], 128  }
 0xe42   :  { %2405 = vsyncadd [#allocation4], 4294967168 }
 0xe43   :  { %1635 = vsyncpa [#allocation3], 1 }
 0xe44   :  { %1636 = vsyncpa [#allocation6], 1 }
 0xe45   :  { %1637 = vsyncpa [#allocation9], 1 }
 0xe46   :  { %1638 = vsyncpa [#allocation4], 1 }

</bundles_post_ra>
